<compile_context>
chip_gen: v7x
topology: tpu7x:2x2x1
jax: 0.10.0
libtpu: 0.0.40
codegen_flags: <defaults>
</compile_context>

<pallas_src>
import functools
import math

import jax
import jax.numpy as jnp
from jax import lax
from jax.experimental import pallas as pl
from jax.experimental.pallas import tpu as pltpu


def _round_up(a, b):
    return ((a + b - 1) // b) * b


def _fourier_embed_kernel(x_ref, b_ref, o_ref, *, P_x, M):
    # x_ref: (tile_n, 1) column of inputs
    # b_ref: (1, M) Fourier basis (same block every grid step)
    # o_ref: (tile_n, 2M) output tile, [cos | sin] along the lane axis
    scale = jnp.float32(2.0 * math.pi / P_x)
    col = x_ref[...].astype(jnp.float32)                 # (tile_n, 1)
    b = b_ref[...].astype(jnp.float32) * scale           # (1, M): 1 vreg op

    if M % 128 == 0:
        # Halves are lane-aligned: two full-width, unmasked stores.
        proj = col * b                                    # (tile_n, M) on the VPU
        o_ref[:, :M] = jnp.cos(proj).astype(o_ref.dtype)
        o_ref[:, M:] = jnp.sin(proj).astype(o_ref.dtype)
    else:
        # Duplicate the basis across the full 2M lane width, select cos/sin
        # with a lane mask, and store once -- a single lane-dense write.
        b2 = jnp.concatenate([b, b], axis=-1)             # (1, 2M)
        proj2 = col * b2                                  # (tile_n, 2M)
        lane = lax.broadcasted_iota(jnp.int32, proj2.shape, 1)
        out = jnp.where(lane < M, jnp.cos(proj2), jnp.sin(proj2))
        o_ref[...] = out.astype(o_ref.dtype)


def fourier_feature_embedding(x, B_x, P_x, *, target_tile_n=1024,
                              out_dtype=jnp.float32):
    """x: (N, D) float, B_x: (1, M) float -> (N, 2M) out_dtype."""
    N = x.shape[0]
    M = B_x.shape[1]

    # Only the first feature column participates (matches x[:, 0:1]).
    x_col = x[:, 0:1].astype(jnp.float32)

    # Large row tile, but keep >= 2 grid steps when N allows it (v7x megacore).
    n_pad = _round_up(N, 8)
    tile_n = min(int(target_tile_n), n_pad)
    if n_pad >= 16 and pl.cdiv(n_pad, tile_n) < 2:
        tile_n = _round_up(pl.cdiv(n_pad, 2), 8)
    grid_n = pl.cdiv(n_pad, tile_n)
    n_total = grid_n * tile_n
    if n_total != N:
        x_col = jnp.pad(x_col, ((0, n_total - N), (0, 0)))

    kernel = functools.partial(_fourier_embed_kernel, P_x=float(P_x), M=M)

    out_bytes = jnp.dtype(out_dtype).itemsize
    cost = pl.CostEstimate(
        flops=2 * n_total * M,                 # scale fold + broadcast multiply
        transcendentals=2 * n_total * M,       # one cos + one sin per (row, feature)
        bytes_accessed=4 * (n_total + M) + out_bytes * n_total * 2 * M,
    )

    out = pl.pallas_call(
        kernel,
        out_shape=jax.ShapeDtypeStruct((n_total, 2 * M), out_dtype),
        grid_spec=pltpu.PrefetchScalarGridSpec(
            num_scalar_prefetch=0,
            grid=(grid_n,),
            in_specs=[
                pl.BlockSpec((tile_n, 1), lambda i: (i, 0)),   # x column tile
                pl.BlockSpec((1, M), lambda i: (0, 0)),        # B_x, every tile
            ],
            out_specs=pl.BlockSpec((tile_n, 2 * M), lambda i: (i, 0)),
        ),
        compiler_params=pltpu.CompilerParams(
            dimension_semantics=("parallel",),
        ),
        cost_estimate=cost,
    )(x_col, B_x.astype(jnp.float32))

    return out[:N] if n_total != N else out


if __name__ == "__main__":
    key = jax.random.PRNGKey(0)
    k_x, k_b1, k_b2 = jax.random.split(key, 3)

    # Small shapes consistent with the module: N samples of (t, theta) pairs.
    N, D = 256, 2
    scales = [5.0]                       # module default
    P_x = 3.7                            # deterministic stand-in for 2*max(|theta|)

    x = jax.random.normal(k_x, (N, D), dtype=jnp.float32)

    def make_B(k, mapping_size):
        # Mirrors: cat([scale * randn(1, m) for scale in scales], dim=1)
        ks = jax.random.split(k, len(scales))
        return jnp.concatenate(
            [s * jax.random.normal(kk, (1, mapping_size), dtype=jnp.float32)
             for s, kk in zip(scales, ks)],
            axis=1,
        )

    def ref_forward(xv, B):
        x_proj = (2.0 * math.pi) * xv[:, 0:1] / P_x @ B
        return jnp.concatenate([jnp.cos(x_proj), jnp.sin(x_proj)], axis=1)

    # Case 1: mapping_size=64 -> M % 128 != 0 (single full-width masked-select store path).
    B1 = make_B(k_b1, 64)
    out1 = jax.block_until_ready(fourier_feature_embedding(x, B1, P_x))
    assert out1.shape == (N, 2 * 64)
    assert jnp.allclose(out1, ref_forward(x, B1), atol=1e-4, rtol=1e-4)

    # Case 2: mapping_size=128 -> M % 128 == 0 (two lane-aligned full stores path).
    B2 = make_B(k_b2, 128)
    out2 = jax.block_until_ready(fourier_feature_embedding(x, B2, P_x))
    assert out2.shape == (N, 2 * 128)
    assert jnp.allclose(out2, ref_forward(x, B2), atol=1e-4, rtol=1e-4)

    print("KERNEL_OK")
</pallas_src>

<mosaic_0001>
module attributes {stable_mosaic.version = 11 : i64} {
  func.func @_fourier_embed_kernel(%arg0: i32, %arg1: memref<128x1xf32, #tpu.memory_space<vmem>>, %arg2: memref<1x64xf32, #tpu.memory_space<vmem>>, %arg3: memref<128x128xf32, #tpu.memory_space<vmem>>) attributes {dimension_semantics = [#tpu.dimension_semantics<parallel>], iteration_bounds = array<i64: 2>, scalar_prefetch = 0 : i64, scratch_operands = 0 : i64, tpu.core_type = #tpu.core_type<tc>, window_params = [{transform_indices = @transform_0, window_bounds = array<i64: 128, 1>}, {pipeline_mode = #tpu.pipeline_mode<synchronous>, transform_indices = @transform_1, window_bounds = array<i64: 1, 64>}, {transform_indices = @transform_2, window_bounds = array<i64: 128, 128>}]} {
    %c0 = arith.constant 0 : index
    %c0_0 = arith.constant 0 : index
    %0 = vector.load %arg1[%c0, %c0_0] : memref<128x1xf32, #tpu.memory_space<vmem>>, vector<128x1xf32>
    %c0_1 = arith.constant 0 : index
    %c0_2 = arith.constant 0 : index
    %1 = vector.load %arg2[%c0_1, %c0_2] : memref<1x64xf32, #tpu.memory_space<vmem>>, vector<1x64xf32>
    %cst = arith.constant 1.69815814 : f32
    %2 = vector.broadcast %cst : f32 to vector<1x64xf32>
    %3 = arith.mulf %1, %2 : vector<1x64xf32>
    %4 = tpu.concatenate %3, %3 in 1 : vector<1x64xf32>, vector<1x64xf32> -> vector<1x128xf32>
    %5 = vector.broadcast %0 : vector<128x1xf32> to vector<128x128xf32>
    %6 = vector.broadcast %4 : vector<1x128xf32> to vector<128x128xf32>
    %7 = arith.mulf %5, %6 : vector<128x128xf32>
    %8 = tpu.iota {dimensions = array<i32: 1>} : vector<128x128xi32>
    %c64_i32 = arith.constant 64 : i32
    %9 = vector.broadcast %c64_i32 : i32 to vector<128x128xi32>
    %10 = arith.cmpi slt, %8, %9 : vector<128x128xi32>
    %11 = math.cos %7 : vector<128x128xf32>
    %12 = math.sin %7 : vector<128x128xf32>
    %13 = arith.select %10, %11, %12 : vector<128x128xi1>, vector<128x128xf32>
    %c0_3 = arith.constant 0 : index
    %c0_4 = arith.constant 0 : index
    %14 = vector.load %arg3[%c0_3, %c0_4] : memref<128x128xf32, #tpu.memory_space<vmem>>, vector<128x128xf32>
    tpu.vector_store %arg3[%c0_3, %c0_4], %13 {strides = array<i32>} : memref<128x128xf32, #tpu.memory_space<vmem>>, vector<128x128xf32>,
    return
  }
  func.func @transform_0(%arg0: i32) -> (i32, i32) {
    %c0_i32 = arith.constant 0 : i32
    %c0_i32_0 = arith.constant 0 : i32
    return %arg0, %c0_i32 : i32, i32
  }
  func.func @transform_1(%arg0: i32) -> (i32, i32) {
    %c0_i32 = arith.constant 0 : i32
    %c0_i32_0 = arith.constant 0 : i32
    %c0_i32_1 = arith.constant 0 : i32
    return %c0_i32, %c0_i32_0 : i32, i32
  }
  func.func @transform_2(%arg0: i32) -> (i32, i32) {
    %c0_i32 = arith.constant 0 : i32
    %c0_i32_0 = arith.constant 0 : i32
    return %arg0, %c0_i32 : i32, i32
  }
}

</mosaic_0001>

<bundles_post_ra>
// kernel: tpu_custom_call.1
= control target key start
LH: loop header
LB: loop body
LE: loop exit
PB: predicated region body
PF: predicated region fallthrough
CT: control target
= control target key end

     0   :  { %7 = vsyncpa [#allocation3], 0  ;;  %s6203_s0 = inlined_call_operand.vmem [shape: f32[256,1], index: 0, kind: input, shape index: {}]   ;;  %s6204_s1 = inlined_call_operand.vmem [shape: f32[1,64], index: 1, kind: input, shape index: {}]   ;;  %s6205_s2 = inlined_call_operand.hbm [shape: f32[256,128], index: 2, kind: output, shape index: {}]  }
   0x1   :  { %9 = vsyncpa [#allocation3 + $0x1], 0  ;;  %s4106_s9 = smov 0   ;;  %s4108_s10 = smov 0  }
   0x2   :  { %s4110_s11 = smov 0   ;;  %s4112_s12 = smov 0  }
   0x3 LB: > { %s4127_s13 = sadd.s32 4294967295, %s4078_s12   ;;  %s3696_s14 = sadd.s32 4294967294, %s4078_s12   ;;  %s4078_s12 = sphi %s4112_s12, %s6501_s12   ;;  %s4074_s11 = sphi %s4110_s11, %s6500_s11   ;;  %s4070_s10 = sphi %s4108_s10, %s6499_s10   ;;  %s4066_s9 = sphi %s4106_s9, %s6498_s9  }
   0x4   : > { %s4131_s15 = sadd.s32 1, %s4078_s12   ;;  %s69_s16 = sadd.s32 1, %s4074_s11 }
   0x5   : > { %s66_s17 = ssub.s32 %s4078_s12, %s4131_s15  ;;  %p79_p0 = scmp.ne.s32.totalorder %s4074_s11, %s4070_s10 }
   0x6   : > { %p67_p1 = scmp.eq.s32.totalorder %s66_s17, 0  ;;  %p80_p2 = scmp.eq.s32.totalorder %s4127_s13, 1 }
   0x7   : > { %p85_p3 = scmp.ne.s32.totalorder %s4070_s10, %s4066_s9  ;;  %p86_p4 = scmp.eq.s32.totalorder %s3696_s14, 1 }
   0x8   : > { %s4142_s18 = scalar_select %p67_p1, %s4074_s11, %s69_s16  }
   0x9   : > { %p4144_p5 = por %p80_p2, %p79_p0  ;;  %p4148_p6 = por %p86_p4, %p85_p3 }
   0xa   : > { %p3699_p7 = scmp.ge.s32.totalorder %s4078_s12, 1  ;;  %p116_p8 = scmp.lt.s32.totalorder %s4078_s12, 3 }
   0xc   : > { %p117_p9 = pnand %p3699_p7, %p116_p8 }
   0xe   : > { %120 = sbr.rel (%p117_p9) target bundleno = 660 (0x294), region = 28 }
  0x15   : > { %s3701_s21 = sshll.u32 %s4127_s13, 4  ;;  %v4080_v0 = vmov 0   ;;  %v164_v11 = vlaneseq  ;;  %v161_v17 = vld [vmem:[%s6204_s1] sm:$0x1]  ;;  %s4081_s28 = smov 64   ;;  %vm171_vm0 = vcmask 523264  }
  0x16   : > { %3951 = vset.pattern.permute.xlu1 %v4080_v0  ;;  %3950 = vset.pattern.permute.xlu0 %v4080_v0  ;;  %p139_p10 = scmp.lt.s32.totalorder %s3701_s21, 31  ;;  %v162_v18 = vmul.f32 1.6981581, %v161_v17  ;;  %v6226_v63 = vmov 683565275   ;;  %s135_s29 = sand.u32 1, %s4070_s10  }
  0x17   : > { %v165_v14 = vshrl.u32 %v164_v11, 7  ;;  %v6214_v17 = vmov 1326507024   ;;  %s3700_s30 = sshll.u32 %s135_s29, 7  ;;  %s3836_s4 = sshll.u32 %s4127_s13, 11 }
  0x18   : > { %s6503_s21 = smov (!%p139_p10, %s3701_s21), 31  ;;  %s6077_s3 = scalar_lea.vmem [#allocation2], %s3700_s30 }
  0x19   : > { %s3702_s22 = sshll.u32 %s6503_s21, 3  ;;  %v166_v19 = vsub.s32 0, %v165_v14  ;;  %s3634_s5 = sshll.u32 %s6077_s3, 4  ;;  %s6155_s5 = int_to_ptr.vmem [resolvable:$true] %s3634_s5 }
  0x1a   : > { %s4158_s25 = scalar_lea.vmem %s6203_s0, %s3702_s22  ;;  %s6153_s8 = scalar_lea.hbm %s6205_s2, %s3836_s4 }
  0x1b   : > { %v147_v1 = vld [vmem:[%s4158_s25 + $0x10] sm:$0xff]  ;;  %v145_v2 = vld [vmem:[%s4158_s25] sm:$0xff]  ;;  %v148_v3 = vld [vmem:[%s4158_s25 + $0x18] sm:$0xff]  ;;  %v167_v22 = vrot.slane %v162_v18, %v166_v19  ;;  %s6162_s13 = scalar_lea.sflag [#allocation3], %s135_s29  ;;  %s4016_s14 = scalar_lea.vmem %s6155_s5, 2048 }
  0x1c   : > { %185 = vperm.xlu1 %3951, %v147_v1   ;;  %175 = vperm.xlu0 %3950, %v145_v2   ;;  %v146_v4 = vld [vmem:[%s4158_s25 + $0x8] sm:$0xff]  ;;  %v149_v6 = vld [vmem:[%s4158_s25 + $0x20] sm:$0xff]  ;;  %v152_v7 = vld [vmem:[%s4158_s25 + $0x38] sm:$0xff]  ;;  %p4017_p11 = scmp.ne.s32.totalorder %s6155_s5, %s4016_s14  ;;  %s4088_s16 = smov [#allocation2]  }
  0x1d   : > { %v150_v5 = vld [vmem:[%s4158_s25 + $0x28] sm:$0xff]  ;;  %v151_v8 = vld [vmem:[%s4158_s25 + $0x30] sm:$0xff]  ;;  %v153_v10 = vld [vmem:[%s4158_s25 + $0x40] sm:$0xff]  ;;  %s4020_s17 = sshll.u32 %s4088_s16, 4  ;;  %s4021_s17 = int_to_ptr.vmem [resolvable:$false] %s4020_s17 }
  0x1e   : > { %v154_v9 = vld [vmem:[%s4158_s25 + $0x48] sm:$0xff]  ;;  %v156_v12 = vld [vmem:[%s4158_s25 + $0x58] sm:$0xff]  ;;  %v155_v13 = vld [vmem:[%s4158_s25 + $0x50] sm:$0xff]  ;;  %p4018_p12 = pnand %p4017_p11, %p4144_p5  ;;  %s4022_s21 = scalar_lea.vmem %s4021_s17, 4096 }
  0x1f   : > { %v158_v15 = vld [vmem:[%s4158_s25 + $0x68] sm:$0xff]  ;;  %v157_v16 = vld [vmem:[%s4158_s25 + $0x60] sm:$0xff]  ;;  %v160_v20 = vld [vmem:[%s4158_s25 + $0x78] sm:$0xff]  ;;  %p4023_p0 = scmp.lt.s32.totalorder %s6155_s5, %s4021_s17  ;;  %p4024_p1 = scmp.lt.s32.totalorder %s4022_s21, %s4016_s14 }
  0x20   : > { %190 = vperm.xlu1 %3951, %v148_v3   ;;  %180 = vperm.xlu0 %3950, %v146_v4   ;;  %v159_v21 = vld [vmem:[%s4158_s25 + $0x70] sm:$0xff]  ;;  %v6212_v3 = vmov 2475754826   ;;  %p4019_p13 = pneg %p4018_p12 }
  0x21   : > { %p4025_p2 = por %p4024_p1, %p4023_p0 }
  0x23   : > { %p4026_p3 = pnand %p4025_p2, %p4019_p13 }
  0x24   : > { %200 = vperm.xlu1 %3951, %v150_v5   ;;  %195 = vperm.xlu0 %3950, %v149_v6   ;;  %v6228_v5 = vmov 2131351028  }
  0x28   : > { %210 = vperm.xlu1 %3951, %v152_v7   ;;  %205 = vperm.xlu0 %3950, %v151_v8   ;;  %v6210_v7 = vmov 2102212464  }
  0x2c   : > { %220 = vperm.xlu1 %3951, %v154_v9   ;;  %215 = vperm.xlu0 %3950, %v153_v10   ;;  %v6216_v9 = vmov 920167782  }
  0x30   : > { %230 = vperm.xlu1 %3951, %v156_v12   ;;  %225 = vperm.xlu0 %3950, %v155_v13  }
  0x34   : > { %240 = vperm.xlu1 %3951, %v158_v15   ;;  %235 = vperm.xlu0 %3950, %v157_v16  }
  0x38   : > { %250 = vperm.xlu1 %3951, %v160_v20   ;;  %245 = vperm.xlu0 %3950, %v159_v21  }
  0x3c   : > { %168 = vrot.lane.b32.xlu0 %v167_v22, %s4081_s28 }
  0x9b   : > { %v176_v23 = vpop.permute.xlu0 %175  ;;  %v186_v36 = vpop.permute.xlu1 %185 }
  0x9f   : > { %v181_v24 = vpop.permute.xlu0 %180 }
  0xa3   : > { %v4180_v25 = vpop.permute.xlu0 %195 }
  0xa7   : > { %v4182_v26 = vpop.permute.xlu0 %205 }
  0xab   : > { %v4184_v27 = vpop.permute.xlu0 %215 }
  0xaf   : > { %v4186_v28 = vpop.permute.xlu0 %225 }
  0xb3   : > { %v4188_v29 = vpop.permute.xlu0 %235 }
  0xb7   : > { %v4190_v30 = vpop.permute.xlu0 %245 }
  0xbb   : > { %v169_v31 = vpop.permute.xlu0 %168 }
  0xbc   : > { %v172_v32 = vsel %vm171_vm0, %v162_v18, %v169_v31 }
  0xbd   : > { %v4192_v33 = vrot.slane %v172_v32, %v166_v19 }
  0xbf   : > { %v4195_v34 = vmul.f32 %v4192_v33, %v176_v23  ;;  %v4198_v35 = vmul.f32 %v4192_v33, %v181_v24  ;;  %v4201_v37 = vmul.f32 %v4192_v33, %v186_v36 }
  0xc1   : > { %6306 = vst [vmem:[#allocation5_spill] sm:$0xff] %v4195_v34  ;;  %v276_v38 = vand.u32 2147483647, %v4195_v34  ;;  %v279_v39 = vand.u32 2139095040, %v4195_v34  ;;  %v379_v40 = vand.u32 2147483647, %v4198_v35 }
  0xc2   : > { %v382_v41 = vand.u32 2139095040, %v4198_v35  ;;  %v485_v46 = vand.u32 2139095040, %v4201_v37 }
  0xc3   : > { %v280_v42 = vshrl.u32 %v279_v39, 23  ;;  %v283_v43 = vand.u32 8388607, %v276_v38  ;;  %v386_v45 = vand.u32 8388607, %v379_v40 }
  0xc4   : > { %v383_v44 = vshrl.u32 %v382_v41, 23  ;;  %v486_v49 = vshrl.u32 %v485_v46, 23 }
  0xc5   : > { %v3703_v47 = vadd.s32 4294967169, %v280_v42  ;;  %v284_v51 = vor.u32 8388608, %v283_v43  ;;  %v387_v52 = vor.u32 8388608, %v386_v45 }
  0xc6   : > { %v3707_v48 = vadd.s32 4294967169, %v383_v44  ;;  %v3711_v54 = vadd.s32 4294967169, %v486_v49 }
  0xc7   : > { %v286_v50 = vadd.s32 1, %v3703_v47  ;;  %v4212_v59 = vshll.u32 %v284_v51, 8  ;;  %v4214_v60 = vshll.u32 %v387_v52, 8 }
  0xc8   : > { %v389_v53 = vadd.s32 1, %v3707_v48  ;;  %v4216_v61 = vadd.s32 1, %v3711_v54 }
  0xc9   : > { %vm287_vm1 = vcmp.gt.s32.totalorder %v286_v50, 0 }
  0xca   : > { %v288_v55 = vsel %vm287_vm1, %v286_v50, 0  ;;  %vm390_vm2 = vcmp.gt.s32.totalorder %v389_v53, 0  ;;  %vm493_vm7 = vcmp.gt.s32.totalorder %v4216_v61, 0 }
  0xcb   : > { %v289_v56 = vshrl.u32 %v288_v55, 5  ;;  %v290_v57 = vand.u32 31, %v288_v55  ;;  %v391_v58 = vsel %vm390_vm2, %v389_v53, 0 }
  0xcc   : > { %v4219_v1 = vshrl.u32 %v391_v58, 5  ;;  %v393_v2 = vand.u32 31, %v391_v58 }
  0xcd   : > { %v291_v62 = vsub.s32 32, %v290_v57  ;;  %v293_v0 = vshll.u32 %v6226_v63, %v290_v57  ;;  %v296_v4 = vshll.u32 %v6212_v3, %v290_v57  ;;  %v299_v6 = vshll.u32 %v6228_v5, %v290_v57 }
  0xce   : > { %v302_v8 = vshll.u32 %v6210_v7, %v290_v57  ;;  %v305_v10 = vshll.u32 %v6216_v9, %v290_v57  ;;  %vm308_vm3 = vcmp.lt.s32.totalorder %v289_v56, 1  ;;  %vm309_vm4 = vcmp.lt.s32.totalorder %v289_v56, 2 }
  0xcf   : > { %v294_v12 = vshrl.u32 %v6212_v3, %v291_v62  ;;  %v297_v13 = vshrl.u32 %v6228_v5, %v291_v62  ;;  %v300_v14 = vshrl.u32 %v6210_v7, %v291_v62  ;;  %v292_v15 = vshrl.u32 %v6226_v63, %v291_v62 }
  0xd0   : > { %v303_v16 = vshrl.u32 %v6216_v9, %v291_v62  ;;  %v306_v18 = vshrl.u32 %v6214_v17, %v291_v62  ;;  %v394_v22 = vsub.s32 32, %v393_v2  ;;  %vm310_vm5 = vcmp.lt.s32.totalorder %v289_v56, 3 }
  0xd1   : > { %v295_v19 = vor.u32 %v294_v12, %v293_v0  ;;  %v298_v20 = vor.u32 %v297_v13, %v296_v4  ;;  %v301_v21 = vor.u32 %v300_v14, %v299_v6  ;;  %vm311_vm6 = vcmp.lt.s32.totalorder %v289_v56, 4 }
  0xd2   : > { %v304_v23 = vor.u32 %v303_v16, %v302_v8  ;;  %v307_v24 = vor.u32 %v306_v18, %v305_v10  ;;  %v396_v44 = vshll.u32 %v6226_v63, %v393_v2  ;;  %v397_v47 = vshrl.u32 %v6212_v3, %v394_v22 }
  0xd3   : > { %v312_v31 = vsel %vm308_vm3, %v292_v15, %v295_v19  ;;  %v313_v32 = vsel %vm311_vm6, %v301_v21, 2102212464  ;;  %v316_v36 = vsel %vm308_vm3, %v295_v19, %v298_v20  ;;  %v320_v39 = vsel %vm308_vm3, %v298_v20, %v301_v21 }
  0xd4   : > { %v314_v41 = vsel %vm310_vm5, %v298_v20, %v313_v32  ;;  %v317_v42 = vsel %vm311_vm6, %v304_v23, 920167782  ;;  %v321_v43 = vsel %vm311_vm6, %v307_v24, 1326507024  ;;  %v399_v48 = vshll.u32 %v6212_v3, %v393_v2 }
  0xd5   : > { %v318_v45 = vsel %vm310_vm5, %v301_v21, %v317_v42  ;;  %v322_v46 = vsel %vm310_vm5, %v304_v23, %v321_v43  ;;  %v315_v49 = vsel %vm309_vm4, %v312_v31, %v314_v41  ;;  %v400_v52 = vshrl.u32 %v6228_v5, %v394_v22 }
  0xd6   : > { %v319_v50 = vsel %vm309_vm4, %v316_v36, %v318_v45  ;;  %v323_v51 = vsel %vm309_vm4, %v320_v39, %v322_v46  ;;  %v398_v58 = vor.u32 %v397_v47, %v396_v44  ;;  %v402_v0 = vshll.u32 %v6228_v5, %v393_v2 }
  0xd7   : > { %v4243_v53 = vmul.u32.u64.low %v4212_v59, %v323_v51  ;;  %v4244_v54 = vmul.u32.u64.high %v4212_v59, %v323_v51, %v4243_v53  ;;  %v4247_v55 = vmul.u32.u64.low %v4212_v59, %v319_v50  ;;  %v4248_v57 = vmul.u32.u64.high %v4212_v59, %v319_v50, %v4247_v55 }
  0xd8   : > { %v401_v62 = vor.u32 %v400_v52, %v399_v48  ;;  %v403_v4 = vshrl.u32 %v6210_v7, %v394_v22  ;;  %v395_v56 = vshrl.u32 %v6226_v63, %v394_v22  ;;  %v405_v6 = vshll.u32 %v6210_v7, %v393_v2 }
  0xd9   : > { %v406_v8 = vshrl.u32 %v6216_v9, %v394_v22  ;;  %v409_v10 = vshrl.u32 %v6214_v17, %v394_v22  ;;  %v331_v12 = vmul.u32 %v4212_v59, %v315_v49  ;;  %v408_v14 = vshll.u32 %v6216_v9, %v393_v2 }
  0xda   : > { %v404_v13 = vor.u32 %v403_v4, %v402_v0  ;;  %vm411_vm8 = vcmp.lt.s32.totalorder %v4219_v1, 1  ;;  %vm333_vm9 = vc.u32 %v4244_v54, %v4247_v55  ;;  %v334_v15 = vadd.s32 1, %v4248_v57 }
  0xdb   : > { %v407_v16 = vor.u32 %v406_v8, %v405_v6  ;;  %vm412_vm10 = vcmp.lt.s32.totalorder %v4219_v1, 2  ;;  %v410_v18 = vor.u32 %v409_v10, %v408_v14  ;;  %vm413_vm11 = vcmp.lt.s32.totalorder %v4219_v1, 3 }
  0xdc   : > { %vm414_vm12 = vcmp.lt.s32.totalorder %v4219_v1, 4  ;;  %v419_v19 = vsel %vm411_vm8, %v398_v58, %v401_v62  ;;  %v335_v59 = vsel %vm333_vm9, %v334_v15, %v4248_v57  ;;  %v423_v21 = vsel %vm411_vm8, %v401_v62, %v404_v13 }
  0xdd   : > { %v416_v20 = vsel %vm414_vm12, %v404_v13, 2102212464  ;;  %v420_v2 = vsel %vm414_vm12, %v407_v16, 920167782  ;;  %v336_v22 = vadd.s32 %v335_v59, %v331_v12  ;;  %v415_v23 = vsel %vm411_vm8, %v395_v56, %v398_v58 }
  0xde   : > { %v421_v24 = vsel %vm413_vm11, %v404_v13, %v420_v2  ;;  %v424_v31 = vsel %vm414_vm12, %v410_v18, 1326507024  ;;  %v417_v32 = vsel %vm413_vm11, %v401_v62, %v416_v20  ;;  %v494_v41 = vsel %vm493_vm7, %v4216_v61, 0  ;;  %v191_v61 = vpop.permute.xlu1 %190 }
  0xdf   : > { %v422_v36 = vsel %vm412_vm10, %v419_v19, %v421_v24  ;;  %v425_v39 = vsel %vm413_vm11, %v407_v16, %v424_v31  ;;  %v337_v42 = vadd.s32 536870912, %v336_v22  ;;  %v418_v49 = vsel %vm412_vm10, %v415_v23, %v417_v32 }
  0xe0   : > { %v426_v43 = vsel %vm412_vm10, %v423_v21, %v425_v39  ;;  %v4275_v44 = vmul.u32.u64.low %v4214_v60, %v422_v36  ;;  %v4276_v45 = vmul.u32.u64.high %v4214_v60, %v422_v36, %v4275_v44  ;;  %v496_v50 = vand.u32 31, %v494_v41 }
  0xe1   : > { %v4280_v46 = vmul.u32.u64.low %v4214_v60, %v426_v43  ;;  %v4281_v47 = vmul.u32.u64.high %v4214_v60, %v426_v43, %v4280_v46  ;;  %v4283_v48 = vshrl.u32 %v337_v42, 30  ;;  %v4290_v57 = vmul.f32 %v4192_v33, %v191_v61 }
  0xe2   : > { %v437_v52 = vadd.s32 1, %v4276_v45  ;;  %v497_v53 = vsub.s32 32, %v496_v50  ;;  %v434_v58 = vmul.u32 %v4214_v60, %v418_v49  ;;  %v6208_v62 = vand.u32 2147483647, %v4201_v37 }
  0xe3   : > { %v339_v51 = vshll.u32 %v4283_v48, 30  ;;  %vm436_vm13 = vc.u32 %v4281_v47, %v4275_v44  ;;  %v499_v8 = vshll.u32 %v6226_v63, %v496_v50  ;;  %v588_v14 = vand.u32 2139095040, %v4290_v57 }
  0xe4   : > { %v438_v1 = vsel %vm436_vm13, %v437_v52, %v4276_v45  ;;  %v500_v56 = vshrl.u32 %v6212_v3, %v497_v53  ;;  %v503_v10 = vshrl.u32 %v6228_v5, %v497_v53  ;;  %v506_v60 = vshrl.u32 %v6210_v7, %v497_v53 }
  0xe5   : > { %v4296_v0 = vsub.s32 %v336_v22, %v339_v51  ;;  %v439_v4 = vadd.s32 %v438_v1, %v434_v58  ;;  %v489_v13 = vand.u32 8388607, %v6208_v62  ;;  %v495_v15 = vshrl.u32 %v494_v41, 5 }
  0xe6   : > { %v501_v16 = vor.u32 %v500_v56, %v499_v8  ;;  %v502_v18 = vshll.u32 %v6212_v3, %v496_v50  ;;  %v505_v19 = vshll.u32 %v6228_v5, %v496_v50  ;;  %v508_v2 = vshll.u32 %v6210_v7, %v496_v50 }
  0xe7   : > { %v342_v6 = vsub.s32 0, %v4296_v0  ;;  %v440_v12 = vadd.s32 536870912, %v439_v4  ;;  %v509_v21 = vshrl.u32 %v6216_v9, %v497_v53  ;;  %v511_v24 = vshll.u32 %v6216_v9, %v496_v50 }
  0xe8   : > { %v504_v22 = vor.u32 %v503_v10, %v502_v18  ;;  %v507_v23 = vor.u32 %v506_v60, %v505_v19  ;;  %v512_v31 = vshrl.u32 %v6214_v17, %v497_v53  ;;  %v589_v39 = vshrl.u32 %v588_v14, 23 }
  0xe9   : > { %v3704_v59 = vmin.u32 %v342_v6, %v4296_v0  ;;  %v4310_v20 = vshrl.u32 %v440_v12, 30  ;;  %v510_v36 = vor.u32 %v509_v21, %v508_v2  ;;  %v490_v41 = vor.u32 8388608, %v489_v13 }
  0xea   : > { %v513_v42 = vor.u32 %v512_v31, %v511_v24  ;;  %vm517_vm14 = vcmp.lt.s32.totalorder %v495_v15, 4  ;;  %vm514_vm15 = vcmp.lt.s32.totalorder %v495_v15, 1  ;;  %vm516_vm0 = vcmp.lt.s32.totalorder %v495_v15, 3 }
  0xeb   : > { %v442_v32 = vshll.u32 %v4310_v20, 30  ;;  %v344_v43 = vclz %v3704_v59  ;;  %v523_v45 = vsel %vm517_vm14, %v510_v36, 920167782  ;;  %v522_v46 = vsel %vm514_vm15, %v501_v16, %v504_v22 }
  0xec   : > { %v524_v49 = vsel %vm516_vm0, %v507_v23, %v523_v45  ;;  %v527_v61 = vsel %vm517_vm14, %v513_v42, 1326507024  ;;  %v519_v50 = vsel %vm517_vm14, %v507_v23, 2102212464  ;;  %v526_v52 = vsel %vm514_vm15, %v504_v22, %v507_v23 }
  0xed   : > { %v4319_v51 = vsub.s32 %v439_v4, %v442_v32  ;;  %v3715_v58 = vadd.s32 4294967169, %v589_v39  ;;  %v498_v1 = vshrl.u32 %v6226_v63, %v497_v53  ;;  %vm515_vm1 = vcmp.lt.s32.totalorder %v495_v15, 2 }
  0xee   : > { %v528_v56 = vsel %vm516_vm0, %v510_v36, %v527_v61  ;;  %v3705_v6 = vadd.s32 4294967294, %v344_v43  ;;  %v525_v8 = vsel %vm515_vm1, %v522_v46, %v524_v49  ;;  %v530_v10 = vshll.u32 %v490_v41, 8  ;;  %v4343_v43 = vpop.permute.xlu1 %200 }
  0xef   : > { %v518_v60 = vsel %vm514_vm15, %v498_v1, %v501_v16  ;;  %v520_v12 = vsel %vm516_vm0, %v504_v22, %v519_v50  ;;  %v529_v13 = vsel %vm515_vm1, %v526_v52, %v528_v56  ;;  %v445_v4 = vsub.s32 0, %v4319_v51 }
  0xf0   : > { %v4327_v14 = vmul.u32.u64.low %v530_v10, %v529_v13  ;;  %v4328_v18 = vmul.u32.u64.high %v530_v10, %v529_v13, %v4327_v14  ;;  %v595_v19 = vadd.s32 1, %v3715_v58  ;;  %vm3706_vm2 = vcmp.lt.s32.totalorder %v3705_v6, 0 }
  0xf1   : > { %v4330_v59 = vmul.u32.u64.low %v530_v10, %v525_v8  ;;  %v4331_v2 = vmul.u32.u64.high %v530_v10, %v525_v8, %v4330_v59  ;;  %v521_v53 = vsel %vm515_vm1, %v518_v60, %v520_v12  ;;  %v3708_v23 = vmin.u32 %v445_v4, %v4319_v51 }
  0xf2   : > { %vm596_vm3 = vcmp.gt.s32.totalorder %v595_v19, 0  ;;  %v4337_v15 = vsel %vm3706_vm2, 0, %v3705_v6  ;;  %v537_v24 = vmul.u32 %v530_v10, %v521_v53  ;;  %v6207_v31 = vand.u32 2147483647, %v4290_v57 }
  0xf3   : > { %v597_v21 = vsel %vm596_vm3, %v595_v19, 0  ;;  %vm539_vm4 = vc.u32 %v4328_v18, %v4330_v59  ;;  %v540_v16 = vadd.s32 1, %v4331_v2  ;;  %v352_v39 = vsub.s32 4294967266, %v4337_v15 }
  0xf4   : > { %v599_v22 = vand.u32 31, %v597_v21  ;;  %v447_v41 = vclz %v3708_v23  ;;  %v592_v45 = vand.u32 8388607, %v6207_v31  ;;  %v332_v46 = vadd.s32 %v4247_v55, %v4244_v54 }
  0xf5   : > { %v541_v32 = vsel %vm539_vm4, %v540_v16, %v4331_v2  ;;  %v353_v50 = vadd.s32 127, %v352_v39  ;;  %v348_v60 = vsub.s32 32, %v4337_v15  ;;  %v598_v55 = vshrl.u32 %v597_v21, 5  ;;  %v211_v2 = vpop.permute.xlu1 %210 }
  0xf6   : > { %v600_v36 = vsub.s32 32, %v599_v22  ;;  %v542_v42 = vadd.s32 %v541_v32, %v537_v24  ;;  %v3709_v52 = vadd.s32 4294967294, %v447_v41  ;;  %v602_v56 = vshll.u32 %v6226_v63, %v599_v22 }
  0xf7   : > { %v605_v6 = vshll.u32 %v6212_v3, %v599_v22  ;;  %v611_v8 = vshll.u32 %v6210_v7, %v599_v22  ;;  %v593_v54 = vor.u32 8388608, %v592_v45  ;;  %v608_v12 = vshll.u32 %v6228_v5, %v599_v22 }
  0xf8   : > { %v603_v49 = vshrl.u32 %v6212_v3, %v600_v36  ;;  %v606_v61 = vshrl.u32 %v6228_v5, %v600_v36  ;;  %v543_v58 = vadd.s32 536870912, %v542_v42  ;;  %v609_v1 = vshrl.u32 %v6210_v7, %v600_v36 }
  0xf9   : > { %v612_v10 = vshrl.u32 %v6216_v9, %v600_v36  ;;  %v615_v19 = vshrl.u32 %v6214_v17, %v600_v36  ;;  %vm3710_vm5 = vcmp.lt.s32.totalorder %v3709_v52, 0  ;;  %v614_v16 = vshll.u32 %v6216_v9, %v599_v22 }
  0xfa   : > { %v604_v13 = vor.u32 %v603_v49, %v602_v56  ;;  %v607_v4 = vor.u32 %v606_v61, %v605_v6  ;;  %v4359_v53 = vshrl.u32 %v543_v58, 30  ;;  %v610_v23 = vor.u32 %v609_v1, %v608_v12 }
  0xfb   : > { %v613_v14 = vor.u32 %v612_v10, %v611_v8  ;;  %v4364_v24 = vmul.f32 %v4192_v33, %v4180_v25  ;;  %v349_v21 = vshll.u32 %v4296_v0, %v4337_v15  ;;  %v354_v32 = vshll.u32 %v353_v50, 23  ;;  %v221_v50 = vpop.permute.xlu1 %220 }
  0xfc   : > { %v350_v39 = vshrl.u32 %v332_v46, %v348_v60  ;;  %v616_v41 = vor.u32 %v615_v19, %v614_v16  ;;  %vm617_vm6 = vcmp.lt.s32.totalorder %v598_v55, 1  ;;  %vm620_vm7 = vcmp.lt.s32.totalorder %v598_v55, 4 }
  0xfd   : > { %6307 = vst [vmem:[#allocation6_spill] sm:$0xff] %v4364_v24  ;;  %v4368_v45 = vsel %vm3710_vm5, 0, %v3709_v52  ;;  %v625_v49 = vsel %vm617_vm6, %v604_v13, %v607_v4  ;;  %v626_v61 = vsel %vm620_vm7, %v613_v14, 920167782  ;;  %v633_v58 = vshll.u32 %v593_v54, 8 }
  0xfe   : > { %v545_v22 = vshll.u32 %v4359_v53, 30  ;;  %v601_v25 = vshrl.u32 %v6226_v63, %v600_v36  ;;  %vm619_vm8 = vcmp.lt.s32.totalorder %v598_v55, 3  ;;  %v622_v1 = vsel %vm620_vm7, %v610_v23, 2102212464 }
  0xff   : > { %v355_v0 = vor.u32 4788187, %v354_v32  ;;  %vm618_vm9 = vcmp.lt.s32.totalorder %v598_v55, 2  ;;  %v627_v15 = vsel %vm619_vm8, %v610_v23, %v626_v61  ;;  %v629_v46 = vsel %vm617_vm6, %v607_v4, %v610_v23 }
 0x100   : > { %v455_v52 = vsub.s32 4294967266, %v4368_v45  ;;  %v621_v56 = vsel %vm617_vm6, %v601_v25, %v604_v13  ;;  %v628_v6 = vsel %vm618_vm9, %v625_v49, %v627_v15  ;;  %v630_v8 = vsel %vm620_vm7, %v616_v41, 1326507024 }
 0x101   : > { %v623_v10 = vsel %vm619_vm8, %v607_v4, %v622_v1  ;;  %v631_v60 = vsel %vm619_vm8, %v613_v14, %v630_v8  ;;  %v4380_v36 = vmul.u32.u64.low %v633_v58, %v628_v6  ;;  %v4381_v54 = vmul.u32.u64.high %v633_v58, %v628_v6, %v4380_v36  ;;  %v231_v14 = vpop.permute.xlu1 %230 }
 0x102   : > { %v4384_v12 = vsub.s32 %v542_v42, %v545_v22  ;;  %v632_v19 = vsel %vm618_vm9, %v629_v46, %v631_v60  ;;  %v351_v23 = vor.u32 %v350_v39, %v349_v21  ;;  %v456_v61 = vadd.s32 127, %v455_v52 }
 0x103   : > { %v4387_v16 = vmul.u32.u64.low %v633_v58, %v632_v19  ;;  %v4388_v32 = vmul.u32.u64.high %v633_v58, %v632_v19, %v4387_v16  ;;  %v624_v13 = vsel %vm618_vm9, %v621_v56, %v623_v10  ;;  %v691_v49 = vand.u32 2139095040, %v4364_v24 }
 0x104   : > { %v356_v41 = vand.u32 2147483647, %v355_v0  ;;  %v643_v4 = vadd.s32 1, %v4381_v54  ;;  %v451_v25 = vsub.s32 32, %v4368_v45  ;;  %v548_v42 = vsub.s32 0, %v4384_v12 }
 0x105   : > { %v358_v22 = vcvt.s32.f32 %v351_v23  ;;  %v640_v1 = vmul.u32 %v633_v58, %v624_v13  ;;  %vm642_vm10 = vc.u32 %v4388_v32, %v4380_v36  ;;  %v692_v21 = vshrl.u32 %v691_v49, 23 }
 0x106   : > { %v435_v55 = vadd.s32 %v4275_v44, %v4281_v47  ;;  %v457_v39 = vshll.u32 %v456_v61, 23  ;;  %v644_v15 = vsel %vm642_vm10, %v643_v4, %v4381_v54  ;;  %v4401_v0 = vand.u32 127, %v164_v11  ;;  %v241_v54 = vpop.permute.xlu1 %240 }
 0x107   : > { %v359_v46 = vmul.f32 %v358_v22, %v356_v41  ;;  %v645_v52 = vadd.s32 %v644_v15, %v640_v1  ;;  %v3719_v56 = vadd.s32 4294967169, %v692_v21  ;;  %v4405_v6 = vmul.f32 %v4192_v33, %v4343_v43 }
 0x108   : > { %6308 = vst [vmem:[#allocation7_spill] sm:$0xff] %v4401_v0  ;;  %v4409_v58 = vmul.f32 %v4192_v33, %v4182_v26  ;;  %v453_v8 = vshrl.u32 %v435_v55, %v451_v25  ;;  %v3712_v44 = vmin.u32 %v548_v42, %v4384_v12  ;;  %v4413_v47 = vmul.f32 %v4192_v33, %v211_v2 }
 0x109   : > { %v4417_v11 = vmul.f32 %v4192_v33, %v4184_v27  ;;  %v646_v10 = vadd.s32 536870912, %v645_v52  ;;  %v698_v60 = vadd.s32 1, %v3719_v56  ;;  %v4420_v43 = vmul.f32 %v4192_v33, %v221_v50 }
 0x10a   : > { %6309 = vst [vmem:[#allocation8_spill] sm:$0xff] %v4409_v58  ;;  %6310 = vst [vmem:[#allocation9_spill] sm:$0xff] %v4413_v47  ;;  %v362_v19 = vsub.s32 4, %v4283_v48  ;;  %v452_v26 = vshll.u32 %v4319_v51, %v4368_v45  ;;  %v458_v23 = vor.u32 4788187, %v457_v39  ;;  %v4427_v2 = vmul.f32 %v4192_v33, %v4186_v28  ;;  %v251_v1 = vpop.permute.xlu1 %250 }
 0x10b   : > { %v360_v16 = vxor.u32 2147483648, %v359_v46  ;;  %v4429_v61 = vshrl.u32 %v646_v10, 30  ;;  %vm699_vm11 = vcmp.gt.s32.totalorder %v698_v60, 0  ;;  %v550_v13 = vclz %v3712_v44 }
 0x10c   : > { %6311 = vst [vmem:[#allocation10_spill] sm:$0xff] %v4427_v2  ;;  %v454_v27 = vor.u32 %v453_v8, %v452_v26  ;;  %v700_v49 = vsel %vm699_vm11, %v698_v60, 0  ;;  %v794_v50 = vand.u32 2139095040, %v4405_v6  ;;  %v4433_v41 = vmul.f32 %v4192_v33, %v231_v14 }
 0x10d   : > { %v4437_v51 = vmul.f32 %v4192_v33, %v4188_v29  ;;  %vm278_vm12 = vcmp.lt.s32.totalorder %v4195_v34, 0  ;;  %v648_v28 = vshll.u32 %v4429_v61, 30  ;;  %v4442_v45 = vmul.f32 %v4192_v33, %v241_v54 }
 0x10e   : > { %6312 = vst [vmem:[#allocation11_spill] sm:$0xff] %v4433_v41  ;;  %v363_v4 = vsel %vm278_vm12, %v362_v19, %v4283_v48  ;;  %v459_v25 = vand.u32 2147483647, %v458_v23  ;;  %v702_v42 = vand.u32 31, %v700_v49  ;;  %vm277_vm13 = vcmp.le.f32.partialorder %v276_v38, 0.7853982 }
 0x10f   : > { %6313 = vst [vmem:[#allocation12_spill] sm:$0xff] %v4442_v45  ;;  %v361_v14 = vsel %vm278_vm12, %v360_v16, %v359_v46  ;;  %v4447_v22 = vsub.s32 %v645_v52, %v648_v28  ;;  %v6206_v29 = vand.u32 2147483647, %v4364_v24  ;;  %v461_v21 = vcvt.s32.f32 %v454_v27 }
 0x110   : > { %v3713_v55 = vadd.s32 4294967294, %v550_v13  ;;  %v703_v39 = vsub.s32 32, %v702_v42  ;;  %v795_v15 = vshrl.u32 %v794_v50, 23  ;;  %v4452_v56 = vmul.f32 %v4192_v33, %v4190_v30 }
 0x111   : > { %v4455_v48 = vmul.f32 %v4192_v33, %v251_v1  ;;  %v4457_v8 = vsel %vm277_vm13, 0, %v363_v4  ;;  %v651_v38 = vsub.s32 0, %v4447_v22  ;;  %v364_v46 = vsel %vm277_vm13, %v4195_v34, %v361_v14 }
 0x112   : > { %6314 = vst [vmem:[#allocation13_spill] sm:$0xff] %v4452_v56  ;;  %6316 = vst [vmem:[#allocation15_spill] sm:$0xff] %v4457_v8  ;;  %v4461_v52 = vmul.f32 %v461_v21, %v459_v25  ;;  %v706_v44 = vshrl.u32 %v6212_v3, %v703_v39  ;;  %v709_v10 = vshrl.u32 %v6228_v5, %v703_v39  ;;  %v695_v30 = vand.u32 8388607, %v6206_v29 }
 0x113   : > { %6315 = vst [vmem:[#allocation14_spill] sm:$0xff] %v4455_v48  ;;  %v3716_v60 = vmin.u32 %v651_v38, %v4447_v22  ;;  %v705_v33 = vshll.u32 %v6226_v63, %v702_v42  ;;  %v708_v54 = vshll.u32 %v6212_v3, %v702_v42  ;;  %vm3714_vm14 = vcmp.lt.s32.totalorder %v3713_v55, 0 }
 0x114   : > { %v701_v19 = vshrl.u32 %v700_v49, 5  ;;  %v711_v26 = vshll.u32 %v6228_v5, %v702_v42  ;;  %v3723_v23 = vadd.s32 4294967169, %v795_v15  ;;  %v712_v50 = vshrl.u32 %v6210_v7, %v703_v39 }
 0x115   : > { %v653_v16 = vclz %v3716_v60  ;;  %v707_v27 = vor.u32 %v706_v44, %v705_v33  ;;  %v710_v13 = vor.u32 %v709_v10, %v708_v54  ;;  %v714_v28 = vshll.u32 %v6210_v7, %v702_v42 }
 0x116   : > { %v715_v4 = vshrl.u32 %v6216_v9, %v703_v39  ;;  %v717_v25 = vshll.u32 %v6216_v9, %v702_v42  ;;  %v718_v14 = vshrl.u32 %v6214_v17, %v703_v39  ;;  %v463_v1 = vxor.u32 2147483648, %v4461_v52 }
 0x117   : > { %v4477_v21 = vsel %vm3714_vm14, 0, %v3713_v55  ;;  %v696_v49 = vor.u32 8388608, %v695_v30  ;;  %v713_v38 = vor.u32 %v712_v50, %v711_v26  ;;  %v704_v15 = vshrl.u32 %v6226_v63, %v703_v39 }
 0x118   : > { %v716_v44 = vor.u32 %v715_v4, %v714_v28  ;;  %v719_v10 = vor.u32 %v718_v14, %v717_v25  ;;  %vm720_vm15 = vcmp.lt.s32.totalorder %v701_v19, 1  ;;  %vm381_vm0 = vcmp.lt.s32.totalorder %v4198_v35, 0 }
 0x119   : > { %v3717_v60 = vadd.s32 4294967294, %v653_v16  ;;  %vm723_vm1 = vcmp.lt.s32.totalorder %v701_v19, 4  ;;  %v728_v33 = vsel %vm720_vm15, %v707_v27, %v710_v13  ;;  %v801_v54 = vadd.s32 1, %v3723_v23 }
 0x11a   : > { %v725_v42 = vsel %vm723_vm1, %v713_v38, 2102212464  ;;  %v729_v29 = vsel %vm723_vm1, %v716_v44, 920167782  ;;  %v732_v31 = vsel %vm720_vm15, %v710_v13, %v713_v38  ;;  %v733_v62 = vsel %vm723_vm1, %v719_v10, 1326507024 }
 0x11b   : > { %v558_v55 = vsub.s32 4294967266, %v4477_v21  ;;  %vm721_vm2 = vcmp.lt.s32.totalorder %v701_v19, 2  ;;  %vm722_vm3 = vcmp.lt.s32.totalorder %v701_v19, 3  ;;  %v736_v30 = vshll.u32 %v696_v49, 8 }
 0x11c   : > { %v724_v26 = vsel %vm720_vm15, %v704_v15, %v707_v27  ;;  %v730_v39 = vsel %vm722_vm3, %v713_v38, %v729_v29  ;;  %v734_v50 = vsel %vm722_vm3, %v716_v44, %v733_v62  ;;  %vm802_vm4 = vcmp.gt.s32.totalorder %v801_v54, 0 }
 0x11d   : > { %vm3718_vm5 = vcmp.lt.s32.totalorder %v3717_v60, 0  ;;  %v726_v28 = vsel %vm722_vm3, %v710_v13, %v725_v42  ;;  %v731_v16 = vsel %vm721_vm2, %v728_v33, %v730_v39  ;;  %v735_v4 = vsel %vm721_vm2, %v732_v31, %v734_v50 }
 0x11e   : > { %v4484_v23 = vmul.u32.u64.low %v736_v30, %v735_v4  ;;  %v4485_v25 = vmul.u32.u64.high %v736_v30, %v735_v4, %v4484_v23  ;;  %v4487_v14 = vmul.u32.u64.low %v736_v30, %v731_v16  ;;  %v4488_v10 = vmul.u32.u64.high %v736_v30, %v731_v16, %v4487_v14 }
 0x11f   : > { %3952 = vcosq.f32 %v364_v46  ;;  %v4492_v49 = vand.u32 3, %v4457_v8  ;;  %v559_v29 = vadd.s32 127, %v558_v55  ;;  %v803_v62 = vsel %vm802_vm4, %v801_v54, 0 }
 0x120   : > { %vm4496_vm6 = vcmp.le.f32.partialorder %v379_v40, 0.7853982  ;;  %v554_v31 = vsub.s32 32, %v4477_v21  ;;  %v727_v13 = vsel %vm721_vm2, %v724_v26, %v726_v28  ;;  %v6209_v38 = vand.u32 2147483647, %v4405_v6 }
 0x121   : > { %v805_v15 = vand.u32 31, %v803_v62  ;;  %3954 = vsinq.f32 %v364_v46  ;;  %v465_v44 = vsub.s32 4, %v4310_v20  ;;  %v538_v33 = vadd.s32 %v4330_v59, %v4328_v18 }
 0x122   : > { %v4507_v54 = vsel %vm3718_vm5, 0, %v3717_v60  ;;  %v464_v40 = vsel %vm381_vm0, %v463_v1, %v4461_v52  ;;  %v568_v42 = vsub.s32 4, %v4359_v53  ;;  %vm745_vm7 = vc.u32 %v4485_v25, %v4487_v14 }
 0x123   : > { %v746_v19 = vadd.s32 1, %v4488_v10  ;;  %v555_v46 = vshll.u32 %v4384_v12, %v4477_v21  ;;  %v560_v55 = vshll.u32 %v559_v29, 23  ;;  %v743_v26 = vmul.u32 %v736_v30, %v727_v13 }
 0x124   : > { %v806_v18 = vsub.s32 32, %v805_v15  ;;  %v556_v59 = vshrl.u32 %v538_v33, %v554_v31  ;;  %v661_v60 = vsub.s32 4294967266, %v4507_v54  ;;  %v798_v52 = vand.u32 8388607, %v6209_v38 }
 0x125   : > { %v747_v39 = vsel %vm745_vm7, %v746_v19, %v4488_v10  ;;  %v808_v50 = vshll.u32 %v6226_v63, %v805_v15  ;;  %v811_v16 = vshll.u32 %v6212_v3, %v805_v15  ;;  %v817_v30 = vshll.u32 %v6210_v7, %v805_v15 }
 0x126   : > { %v748_v1 = vadd.s32 %v747_v39, %v743_v26  ;;  %v809_v28 = vshrl.u32 %v6212_v3, %v806_v18  ;;  %v812_v12 = vshrl.u32 %v6228_v5, %v806_v18  ;;  %v815_v21 = vshrl.u32 %v6210_v7, %v806_v18 }
 0x127   : > { %v818_v4 = vshrl.u32 %v6216_v9, %v806_v18  ;;  %v561_v23 = vor.u32 4788187, %v560_v55  ;;  %v804_v29 = vshrl.u32 %v803_v62, 5  ;;  %v814_v31 = vshll.u32 %v6228_v5, %v805_v15 }
 0x128   : > { %v749_v10 = vadd.s32 536870912, %v748_v1  ;;  %v810_v13 = vor.u32 %v809_v28, %v808_v50  ;;  %v813_v33 = vor.u32 %v812_v12, %v811_v16  ;;  %v821_v26 = vshrl.u32 %v6214_v17, %v806_v18 }
 0x129   : > { %v819_v19 = vor.u32 %v818_v4, %v817_v30  ;;  %v4531_v39 = vpop.eup %3952  ;;  %v4536_v38 = vsel %vm4496_vm6, %v4198_v35, %v464_v40  ;;  %v816_v3 = vor.u32 %v815_v21, %v814_v31  ;;  %v820_v55 = vshll.u32 %v6216_v9, %v805_v15 }
 0x12a   : > { %6319 = vst [vmem:[#allocation16_spill] sm:$0xff] %v4531_v39  ;;  %v4538_v7 = vshrl.u32 %v749_v10, 30  ;;  %v557_v62 = vor.u32 %v556_v59, %v555_v46  ;;  %v641_v50 = vadd.s32 %v4380_v36, %v4388_v32  ;;  %v662_v28 = vadd.s32 127, %v661_v60 }
 0x12b   : > { %v799_v16 = vor.u32 8388608, %v798_v52  ;;  %v4543_v12 = vpop.eup %3954  ;;  %v822_v4 = vor.u32 %v821_v26, %v820_v55  ;;  %vm823_vm8 = vcmp.lt.s32.totalorder %v804_v29, 1  ;;  %vm826_vm9 = vcmp.lt.s32.totalorder %v804_v29, 4 }
 0x12c   : > { %6320 = vst [vmem:[#allocation17_spill] sm:$0xff] %v4543_v12  ;;  %v751_v30 = vshll.u32 %v4538_v7, 30  ;;  %v562_v40 = vand.u32 2147483647, %v561_v23  ;;  %vm825_vm10 = vcmp.lt.s32.totalorder %v804_v29, 3  ;;  %v831_v10 = vsel %vm823_vm8, %v810_v13, %v813_v33 }
 0x12d   : > { %v832_v21 = vsel %vm826_vm9, %v819_v19, 920167782  ;;  %vm484_vm11 = vcmp.lt.s32.totalorder %v4201_v37, 0  ;;  %v657_v15 = vsub.s32 32, %v4507_v54  ;;  %vm824_vm12 = vcmp.lt.s32.totalorder %v804_v29, 2 }
 0x12e   : > { %v4550_v36 = vsub.s32 %v748_v1, %v751_v30  ;;  %v833_v32 = vsel %vm825_vm10, %v816_v3, %v832_v21  ;;  %v564_v46 = vcvt.s32.f32 %v557_v62  ;;  %v663_v59 = vshll.u32 %v662_v28, 23 }
 0x12f   : > { %v834_v60 = vsel %vm824_vm12, %v831_v10, %v833_v32  ;;  %v839_v52 = vshll.u32 %v799_v16, 8  ;;  %v828_v31 = vsel %vm826_vm9, %v816_v3, 2102212464  ;;  %v835_v26 = vsel %vm823_vm8, %v813_v33, %v816_v3 }
 0x130   : > { %v754_v23 = vsub.s32 0, %v4550_v36  ;;  %v836_v55 = vsel %vm826_vm9, %v822_v4, 1326507024  ;;  %v807_v17 = vshrl.u32 %v6226_v63, %v806_v18  ;;  %3956 = vcosq.f32 %v4536_v38 }
 0x131   : > { %v837_v1 = vsel %vm825_vm10, %v819_v19, %v836_v55  ;;  %v4560_v30 = vmul.u32.u64.low %v839_v52, %v834_v60  ;;  %v4561_v9 = vmul.u32.u64.high %v839_v52, %v834_v60, %v4560_v30  ;;  %v565_v62 = vmul.f32 %v564_v46, %v562_v40 }
 0x132   : > { %v659_v28 = vshrl.u32 %v641_v50, %v657_v15  ;;  %v3720_v16 = vmin.u32 %v754_v23, %v4550_v36  ;;  %v827_v10 = vsel %vm823_vm8, %v807_v17, %v810_v13  ;;  %v829_v3 = vsel %vm825_vm10, %v813_v33, %v828_v31 }
 0x133   : > { %v838_v4 = vsel %vm824_vm12, %v835_v26, %v837_v1  ;;  %v897_v18 = vand.u32 2139095040, %v4409_v58  ;;  %v6321_v19 = vand.u32 2147483647, %v4201_v37  ;;  %v658_v50 = vshll.u32 %v4447_v22, %v4507_v54 }
 0x134   : > { %v756_v32 = vclz %v3720_v16  ;;  %v4576_v60 = vmul.u32.u64.low %v839_v52, %v838_v4  ;;  %v4577_v40 = vmul.u32.u64.high %v839_v52, %v838_v4, %v4576_v60  ;;  %v664_v17 = vor.u32 4788187, %v663_v59 }
 0x135   : > { %vm4572_vm13 = vcmp.le.f32.partialorder %v6321_v19, 0.7853982  ;;  %v849_v13 = vadd.s32 1, %v4561_v9  ;;  %v898_v33 = vshrl.u32 %v897_v18, 23  ;;  %vm371_vm14 = vcmp.eq.s32.totalorder %v4492_v49, 0 }
 0x136   : > { %v466_v15 = vsel %vm381_vm0, %v465_v44, %v4310_v20  ;;  %v3721_v46 = vadd.s32 4294967294, %v756_v32  ;;  %v830_v23 = vsel %vm824_vm12, %v827_v10, %v829_v3  ;;  %v566_v31 = vxor.u32 2147483648, %v565_v62 }
 0x137   : > { %v569_v22 = vsel %vm484_vm11, %v568_v42, %v4359_v53  ;;  %vm587_vm15 = vcmp.lt.s32.totalorder %v4290_v57, 0  ;;  %v660_v54 = vor.u32 %v659_v28, %v658_v50  ;;  %v3727_v59 = vadd.s32 4294967169, %v898_v33 }
 0x138   : > { %v6219_v26 = vxor.u32 2147483648, %v4543_v12  ;;  %vm374_vm1 = vcmp.eq.s32.totalorder %v4492_v49, 2  ;;  %v6218_v20 = vxor.u32 2147483648, %v4531_v39  ;;  %vm848_vm0 = vc.u32 %v4577_v40, %v4560_v30 }
 0x139   : > { %v665_v44 = vand.u32 2147483647, %v664_v17  ;;  %v846_v29 = vmul.u32 %v839_v52, %v830_v23  ;;  %v850_v55 = vsel %vm848_vm0, %v849_v13, %v4561_v9  ;;  %v904_v1 = vadd.s32 1, %v3727_v59 }
 0x13a   : > { %v4603_v53 = vsel %vm4496_vm6, 0, %v466_v15  ;;  %v4607_v42 = vsel %vm4572_vm13, 0, %v569_v22  ;;  %vm3722_vm2 = vcmp.lt.s32.totalorder %v3721_v46, 0  ;;  %v6220_v28 = vand.u32 2147483647, %v4409_v58  ;;  %v4612_v52 = vpop.eup %3956 }
 0x13b   : > { %6324 = vst [vmem:[#allocation18_spill] sm:$0xff] %v4603_v53  ;;  %6325 = vst [vmem:[#allocation19_spill] sm:$0xff] %v4607_v42  ;;  %v567_v16 = vsel %vm484_vm11, %v566_v31, %v565_v62  ;;  %v667_v10 = vcvt.s32.f32 %v660_v54  ;;  %v851_v3 = vadd.s32 %v850_v55, %v846_v29  ;;  %vm905_vm3 = vcmp.gt.s32.totalorder %v904_v1, 0 }
 0x13c   : > { %6326 = vst [vmem:[#allocation20_spill] sm:$0xff] %v4612_v52  ;;  %v373_v9 = vsel %vm371_vm14, %v4531_v39, %v6219_v26  ;;  %v376_v27 = vsel %vm374_vm1, %v6218_v20, %v4543_v12  ;;  %v671_v4 = vsub.s32 4, %v4429_v61  ;;  %v906_v62 = vsel %vm905_vm3, %v904_v1, 0 }
 0x13d   : > { %v668_v18 = vmul.f32 %v667_v10, %v665_v44  ;;  %v4625_v19 = vsel %vm3722_vm2, 0, %v3721_v46  ;;  %v852_v32 = vadd.s32 536870912, %v851_v3  ;;  %v908_v60 = vand.u32 31, %v906_v62 }
 0x13e   : > { %vm370_vm4 = vcmp.lt.s32.totalorder %v4492_v49, 2  ;;  %v4629_v50 = vand.u32 3, %v4603_v53  ;;  %v570_v17 = vsel %vm4572_vm13, %v4201_v37, %v567_v16  ;;  %v901_v13 = vand.u32 8388607, %v6220_v28 }
 0x13f   : > { %3958 = vsinq.f32 %v4536_v38  ;;  %v4638_v33 = vand.u32 3, %v4607_v42  ;;  %v4640_v15 = vshrl.u32 %v852_v32, 30  ;;  %v909_v46 = vsub.s32 32, %v908_v60 }
 0x140   : > { %v4642_v23 = vsel %vm370_vm4, %v373_v9, %v376_v27  ;;  %v4648_v21 = vsel %vm587_vm15, %v671_v4, %v4429_v61  ;;  %v764_v31 = vsub.s32 4294967266, %v4625_v19  ;;  %3960 = vcosq.f32 %v570_v17 }
 0x141   : > { %v669_v22 = vxor.u32 2147483648, %v668_v18  ;;  %v854_v38 = vshll.u32 %v4640_v15, 30  ;;  %v6327_v54 = vmov 2475754826   ;;  %v902_v44 = vor.u32 8388608, %v901_v13 }
 0x142   : > { %v912_v59 = vshrl.u32 %v6327_v54, %v909_v46  ;;  %v915_v29 = vshrl.u32 %v6228_v5, %v909_v46  ;;  %v6328_v55 = vmov 920167782   ;;  %v1000_v16 = vand.u32 2139095040, %v4413_v47 }
 0x143   : > { %v921_v1 = vshrl.u32 %v6328_v55, %v909_v46  ;;  %v4656_v10 = vsub.s32 %v851_v3, %v854_v38  ;;  %v911_v61 = vshll.u32 %v6226_v63, %v908_v60  ;;  %v914_v9 = vshll.u32 %v6327_v54, %v908_v60 }
 0x144   : > { %v6329_v27 = vmov 2102212464   ;;  %v765_v32 = vadd.s32 127, %v764_v31  ;;  %v907_v20 = vshrl.u32 %v906_v62, 5  ;;  %v917_v26 = vshll.u32 %v6228_v5, %v908_v60 }
 0x145   : > { %v918_v4 = vshrl.u32 %v6329_v27, %v909_v46  ;;  %v920_v13 = vshll.u32 %v6329_v27, %v908_v60  ;;  %v857_v28 = vsub.s32 0, %v4656_v10  ;;  %v913_v49 = vor.u32 %v912_v59, %v911_v61 }
 0x146   : > { %v916_v0 = vor.u32 %v915_v29, %v914_v9  ;;  %v6330_v39 = vmov 1326507024   ;;  %3962 = vsinq.f32 %v570_v17  ;;  %v744_v3 = vadd.s32 %v4487_v14, %v4485_v25 }
 0x147   : > { %v924_v12 = vshrl.u32 %v6330_v39, %v909_v46  ;;  %v922_v38 = vor.u32 %v921_v1, %v920_v13  ;;  %v923_v63 = vshll.u32 %v6328_v55, %v908_v60  ;;  %v670_v62 = vsel %vm587_vm15, %v669_v22, %v668_v18 }
 0x148   : > { %v760_v31 = vsub.s32 32, %v4625_v19  ;;  %v3724_v5 = vmin.u32 %v857_v28, %v4656_v10  ;;  %v919_v42 = vor.u32 %v918_v4, %v917_v26  ;;  %vm926_vm5 = vcmp.lt.s32.totalorder %v907_v20, 1 }
 0x149   : > { %v925_v53 = vor.u32 %v924_v12, %v923_v63  ;;  %v4672_v59 = vshll.u32 %v902_v44, 8  ;;  %v1001_v29 = vshrl.u32 %v1000_v16, 23  ;;  %v4674_v17 = vpop.eup %3958  ;;  %vm368_vm6 = vweird.f32 %v4195_v34 }
 0x14a   : > { %6331 = vst [vmem:[#allocation21_spill] sm:$0xff] %v4674_v17  ;;  %v766_v25 = vshll.u32 %v765_v32, 23  ;;  %v859_v14 = vclz %v3724_v5  ;;  %vm929_vm7 = vcmp.lt.s32.totalorder %v907_v20, 4  ;;  %v934_v60 = vsel %vm926_vm5, %v913_v49, %v916_v0  ;;  %v4685_v28 = vpop.eup %3960 }
 0x14b   : > { %v6332_v18 = vand.u32 2147483647, %v4290_v57  ;;  %v6335_v63 = vmov 683565275   ;;  %vm927_vm9 = vcmp.lt.s32.totalorder %v907_v20, 2  ;;  %vm928_vm10 = vcmp.lt.s32.totalorder %v907_v20, 3 }
 0x14c   : > { %v910_v12 = vshrl.u32 %v6335_v63, %v909_v46  ;;  %v935_v26 = vsel %vm929_vm7, %v922_v38, 920167782  ;;  %6336 = vst [vmem:[#allocation22_spill] sm:$0xff] %v4685_v28  ;;  %v3725_v44 = vadd.s32 4294967294, %v859_v14  ;;  %v931_v1 = vsel %vm929_vm7, %v919_v42, 2102212464 }
 0x14d   : > { %vm4680_vm8 = vcmp.le.f32.partialorder %v6332_v18, 0.7853982  ;;  %v936_v5 = vsel %vm928_vm10, %v919_v42, %v935_v26  ;;  %v938_v16 = vsel %vm926_vm5, %v916_v0, %v919_v42  ;;  %vm477_vm11 = vcmp.eq.s32.totalorder %v4629_v50, 2 }
 0x14e   : > { %v930_v61 = vsel %vm926_vm5, %v910_v12, %v913_v49  ;;  %v937_v9 = vsel %vm927_vm9, %v934_v60, %v936_v5  ;;  %v939_v4 = vsel %vm929_vm7, %v925_v53, 1326507024  ;;  %v3731_v32 = vadd.s32 4294967169, %v1001_v29 }
 0x14f   : > { %vm474_vm12 = vcmp.eq.s32.totalorder %v4629_v50, 0  ;;  %vm3726_vm13 = vcmp.lt.s32.totalorder %v3725_v44, 0  ;;  %v940_v46 = vsel %vm928_vm10, %v922_v38, %v939_v4  ;;  %v932_v42 = vsel %vm928_vm10, %v916_v0, %v931_v1 }
 0x150   : > { %v4695_v13 = vmul.u32.u64.low %v4672_v59, %v937_v9  ;;  %v4696_v14 = vmul.u32.u64.high %v4672_v59, %v937_v9, %v4695_v13  ;;  %v862_v18 = vsel %vm3726_vm13, 0, %v3725_v44  ;;  %v941_v26 = vsel %vm927_vm9, %v938_v16, %v940_v46  ;;  %v4704_v5 = vpop.eup %3962 }
 0x151   : > { %v1007_v49 = vadd.s32 1, %v3731_v32  ;;  %v761_v53 = vshll.u32 %v4550_v36, %v4625_v19  ;;  %v762_v29 = vshrl.u32 %v744_v3, %v760_v31  ;;  %v867_v60 = vsub.s32 4294967266, %v862_v18 }
 0x152   : > { %v6233_v12 = vand.u32 2147483647, %v4413_v47  ;;  %v767_v38 = vor.u32 4788187, %v766_v25  ;;  %v4707_v9 = vmul.u32.u64.low %v4672_v59, %v941_v26  ;;  %v4708_v4 = vmul.u32.u64.high %v4672_v59, %v941_v26, %v4707_v9 }
 0x153   : > { %vm1008_vm14 = vcmp.gt.s32.totalorder %v1007_v49, 0  ;;  %v868_v44 = vadd.s32 127, %v867_v60  ;;  %v933_v0 = vsel %vm927_vm9, %v930_v61, %v932_v42  ;;  %v952_v1 = vadd.s32 1, %v4696_v14 }
 0x154   : > { %v1009_v16 = vsel %vm1008_vm14, %v1007_v49, 0  ;;  %v4715_v36 = vsel %vm368_vm6, nan, %v4642_v23  ;;  %v6232_v19 = vxor.u32 2147483648, %v4674_v17  ;;  %v863_v3 = vsub.s32 32, %v862_v18 }
 0x155   : > { %6337 = vst [vmem:[#allocation23_spill] sm:$0xff] %v4715_v36  ;;  %v1011_v31 = vand.u32 31, %v1009_v16  ;;  %v673_v25 = vsel %vm4680_vm8, %v4290_v57, %v670_v62  ;;  %v4724_v20 = vsel %vm4680_vm8, 0, %v4648_v21  ;;  %v763_v61 = vor.u32 %v762_v29, %v761_v53 }
 0x156   : > { %6338 = vst [vmem:[#allocation24_spill] sm:$0xff] %v4724_v20  ;;  %v847_v32 = vadd.s32 %v4560_v30, %v4577_v40  ;;  %v869_v46 = vshll.u32 %v868_v44, 23  ;;  %v949_v23 = vmul.u32 %v4672_v59, %v933_v0  ;;  %vm951_vm15 = vc.u32 %v4708_v4, %v4695_v13 }
 0x157   : > { %v1012_v42 = vsub.s32 32, %v1011_v31  ;;  %v6339_v26 = vxor.u32 2147483648, %v4612_v52  ;;  %v768_v21 = vand.u32 2147483647, %v767_v38  ;;  %v953_v22 = vsel %vm951_vm15, %v952_v1, %v4696_v14 }
 0x158   : > { %v1004_v30 = vand.u32 8388607, %v6233_v12  ;;  %v4746_v40 = vsel %vm474_vm12, %v4612_v52, %v6232_v19  ;;  %v4749_v59 = vand.u32 3, %v4724_v20  ;;  %v865_v49 = vshrl.u32 %v847_v32, %v863_v3 }
 0x159   : > { %v4736_v62 = vsel %vm477_vm11, %v6339_v26, %v4674_v17  ;;  %v954_v53 = vadd.s32 %v953_v22, %v949_v23  ;;  %3964 = vcosq.f32 %v673_v25  ;;  %v770_v14 = vcvt.s32.f32 %v763_v61 }
 0x15a   : > { %v864_v38 = vshll.u32 %v4656_v10, %v862_v18  ;;  %v870_v9 = vor.u32 4788187, %v869_v46  ;;  %v1015_v0 = vshrl.u32 %v6327_v54, %v1012_v42  ;;  %v1005_v26 = vor.u32 8388608, %v1004_v30 }
 0x15b   : > { %v955_v44 = vadd.s32 536870912, %v954_v53  ;;  %v4755_v1 = vmul.f32 %v770_v14, %v768_v21  ;;  %v6340_v19 = vmov 2131351028   ;;  %v1021_v3 = vshrl.u32 %v6329_v27, %v1012_v42 }
 0x15c   : > { %v1018_v12 = vshrl.u32 %v6340_v19, %v1012_v42  ;;  %v866_v32 = vor.u32 %v865_v49, %v864_v38  ;;  %v1014_v22 = vshll.u32 %v6335_v63, %v1011_v31  ;;  %v1024_v61 = vshrl.u32 %v6328_v55, %v1012_v42 }
 0x15d   : > { %v4759_v23 = vshrl.u32 %v955_v44, 30  ;;  %v1017_v10 = vshll.u32 %v6327_v54, %v1011_v31  ;;  %v1020_v18 = vshll.u32 %v6340_v19, %v1011_v31  ;;  %v1023_v46 = vshll.u32 %v6329_v27, %v1011_v31 }
 0x15e   : > { %v1027_v21 = vshrl.u32 %v6330_v39, %v1012_v42  ;;  %v871_v30 = vand.u32 2147483647, %v870_v9  ;;  %v1010_v29 = vshrl.u32 %v1009_v16, 5  ;;  %v1016_v60 = vor.u32 %v1015_v0, %v1014_v22 }
 0x15f   : > { %v957_v14 = vshll.u32 %v4759_v23, 30  ;;  %v1019_v49 = vor.u32 %v1018_v12, %v1017_v10  ;;  %v1022_v38 = vor.u32 %v1021_v3, %v1020_v18  ;;  %v1025_v44 = vor.u32 %v1024_v61, %v1023_v46 }
 0x160   : > { %v1026_v36 = vshll.u32 %v6328_v55, %v1011_v31  ;;  %vm473_vm1 = vcmp.lt.s32.totalorder %v4629_v50, 2  ;;  %vm580_vm0 = vcmp.eq.s32.totalorder %v4638_v33, 2  ;;  %3966 = vsinq.f32 %v673_v25 }
 0x161   : > { %vm690_vm2 = vcmp.lt.s32.totalorder %v4364_v24, 0  ;;  %v772_v52 = vxor.u32 2147483648, %v4755_v1  ;;  %v774_v9 = vsub.s32 4, %v4538_v7  ;;  %v4774_v17 = vsub.s32 %v954_v53, %v957_v14 }
 0x162   : > { %v873_v16 = vcvt.s32.f32 %v866_v32  ;;  %v1028_v0 = vor.u32 %v1027_v21, %v1026_v36  ;;  %v4776_v12 = vshll.u32 %v1005_v26, 8  ;;  %v1103_v3 = vand.u32 2139095040, %v4417_v11 }
 0x163   : > { %vm577_vm3 = vcmp.eq.s32.totalorder %v4638_v33, 0  ;;  %v960_v31 = vsub.s32 0, %v4774_v17  ;;  %v1013_v25 = vshrl.u32 %v6335_v63, %v1012_v42  ;;  %vm1029_vm4 = vcmp.lt.s32.totalorder %v1010_v29, 1  ;;  %v4782_v22 = vpop.eup %3964 }
 0x164   : > { %vm1032_vm5 = vcmp.lt.s32.totalorder %v1010_v29, 4  ;;  %v6341_v61 = vand.u32 2147483647, %v4364_v24  ;;  %vm793_vm8 = vcmp.lt.s32.totalorder %v4405_v6, 0  ;;  %v874_v36 = vmul.f32 %v873_v16, %v871_v30 }
 0x165   : > { %v1034_v26 = vsel %vm1032_vm5, %v1022_v38, 2102212464  ;;  %v1037_v32 = vsel %vm1029_vm4, %v1016_v60, %v1019_v49  ;;  %v1038_v10 = vsel %vm1032_vm5, %v1025_v44, 920167782  ;;  %v3728_v18 = vmin.u32 %v960_v31, %v4774_v17 }
 0x166   : > { %vm4786_vm7 = vcmp.le.f32.partialorder %v6341_v61, 0.7853982  ;;  %vm1030_vm9 = vcmp.lt.s32.totalorder %v1010_v29, 2  ;;  %vm1031_vm10 = vcmp.lt.s32.totalorder %v1010_v29, 3  ;;  %v1041_v42 = vsel %vm1029_vm4, %v1019_v49, %v1022_v38 }
 0x167   : > { %vm576_vm11 = vcmp.lt.s32.totalorder %v4638_v33, 2  ;;  %v1033_v46 = vsel %vm1029_vm4, %v1013_v25, %v1016_v60  ;;  %v1039_v21 = vsel %vm1031_vm10, %v1022_v38, %v1038_v10  ;;  %v1042_v14 = vsel %vm1032_vm5, %v1028_v0, 1326507024 }
 0x168   : > { %v1104_v61 = vshrl.u32 %v1103_v3, 23  ;;  %v6344_v34 = vand.u32 2147483647, %v4405_v6  ;;  %v962_v30 = vclz %v3728_v18  ;;  %v1035_v16 = vsel %vm1031_vm10, %v1019_v49, %v1034_v26 }
 0x169   : > { %v1040_v8 = vsel %vm1030_vm9, %v1037_v32, %v1039_v21  ;;  %v1043_v31 = vsel %vm1031_vm10, %v1025_v44, %v1042_v14  ;;  %v875_v38 = vxor.u32 2147483648, %v874_v36  ;;  %v4814_v49 = vsel %vm473_vm1, %v4746_v40, %v4736_v62 }
 0x16a   : > { %vm4795_vm12 = vcmp.le.f32.partialorder %v6344_v34, 0.7853982  ;;  %v1044_v48 = vsel %vm1030_vm9, %v1041_v42, %v1043_v31  ;;  %v4802_v56 = vmul.u32.u64.low %v4776_v12, %v1040_v8  ;;  %v4803_v45 = vmul.u32.u64.high %v4776_v12, %v1040_v8, %v4802_v56  ;;  %v4824_v32 = vpop.eup %3966 }
 0x16b   : > { %v3735_v60 = vadd.s32 4294967169, %v1104_v61  ;;  %v3729_v0 = vadd.s32 4294967294, %v962_v30  ;;  %v4807_v34 = vmul.u32.u64.low %v4776_v12, %v1044_v48  ;;  %v4808_v3 = vmul.u32.u64.high %v4776_v12, %v1044_v48, %v4807_v34 }
 0x16c   : > { %v6347_v44 = vxor.u32 2147483648, %v4685_v28  ;;  %v775_v25 = vsel %vm690_vm2, %v774_v9, %v4538_v7  ;;  %v773_v48 = vsel %vm690_vm2, %v772_v52, %v4755_v1  ;;  %v1036_v50 = vsel %vm1030_vm9, %v1033_v46, %v1035_v16 }
 0x16d   : > { %v1110_v26 = vadd.s32 1, %v3735_v60  ;;  %vm3730_vm13 = vcmp.lt.s32.totalorder %v3729_v0, 0  ;;  %v6245_v62 = vand.u32 2147483647, %v4417_v11  ;;  %v6348_v40 = vxor.u32 2147483648, %v4704_v5 }
 0x16e   : > { %v582_v8 = vsel %vm580_vm0, %v6347_v44, %v4704_v5  ;;  %v965_v18 = vsel %vm3730_vm13, 0, %v3729_v0  ;;  %v1055_v7 = vadd.s32 1, %v4803_v45  ;;  %vm683_vm15 = vcmp.eq.s32.totalorder %v4749_v59, 2 }
 0x16f   : > { %v579_v10 = vsel %vm577_vm3, %v4685_v28, %v6348_v40  ;;  %vm1111_vm14 = vcmp.gt.s32.totalorder %v1110_v26, 0  ;;  %v4840_v52 = vsel %vm4786_vm7, 0, %v775_v25  ;;  %v876_v29 = vsel %vm793_vm8, %v875_v38, %v874_v36 }
 0x170   : > { %6349 = vst [vmem:[#allocation25_spill] sm:$0xff] %v4840_v52  ;;  %v970_v1 = vsub.s32 4294967266, %v965_v18  ;;  %v776_v9 = vsel %vm4786_vm7, %v4364_v24, %v773_v48  ;;  %v1052_v42 = vmul.u32 %v4776_v12, %v1036_v50  ;;  %vm1054_vm1 = vc.u32 %v4808_v3, %v4802_v56 }
 0x171   : > { %v1112_v46 = vsel %vm1111_vm14, %v1110_v26, 0  ;;  %v4852_v21 = vsel %vm576_vm11, %v579_v10, %v582_v8  ;;  %v6244_v14 = vxor.u32 2147483648, %v4782_v22  ;;  %v1056_v61 = vsel %vm1054_vm1, %v1055_v7, %v4803_v45 }
 0x172   : > { %v1107_v36 = vand.u32 8388607, %v6245_v62  ;;  %v879_v53 = vsel %vm4795_vm12, %v4405_v6, %v876_v29  ;;  %v966_v12 = vsub.s32 32, %v965_v18  ;;  %v1057_v30 = vadd.s32 %v1056_v61, %v1052_v42 }
 0x173   : > { %v1114_v16 = vand.u32 31, %v1112_v46  ;;  %3968 = vcosq.f32 %v776_v9  ;;  %v4863_v33 = vand.u32 3, %v4840_v52  ;;  %v971_v60 = vadd.s32 127, %v970_v1 }
 0x174   : > { %3970 = vsinq.f32 %v776_v9  ;;  %v950_v45 = vadd.s32 %v4695_v13, %v4708_v4  ;;  %v1058_v38 = vadd.s32 536870912, %v1057_v30  ;;  %v4872_v34 = vsel %vm683_vm15, %v6244_v14, %v4824_v32 }
 0x175   : > { %v1115_v0 = vsub.s32 32, %v1114_v16  ;;  %v877_v44 = vsub.s32 4, %v4640_v15  ;;  %3972 = vcosq.f32 %v879_v53  ;;  %v1108_v8 = vor.u32 8388608, %v1107_v36 }
 0x176   : > { %v968_v25 = vshrl.u32 %v950_v45, %v966_v12  ;;  %v4875_v26 = vshrl.u32 %v1058_v38, 30  ;;  %v972_v4 = vshll.u32 %v971_v60, 23  ;;  %v1117_v50 = vshll.u32 %v6335_v63, %v1114_v16 }
 0x177   : > { %v1118_v48 = vshrl.u32 %v6327_v54, %v1115_v0  ;;  %v1121_v13 = vshrl.u32 %v6340_v19, %v1115_v0  ;;  %v1124_v40 = vshrl.u32 %v6329_v27, %v1115_v0  ;;  %v1127_v10 = vshrl.u32 %v6328_v55, %v1115_v0 }
 0x178   : > { %v1060_v7 = vshll.u32 %v4875_v26, 30  ;;  %v1120_v29 = vshll.u32 %v6327_v54, %v1114_v16  ;;  %v1123_v1 = vshll.u32 %v6340_v19, %v1114_v16  ;;  %v1206_v9 = vand.u32 2139095040, %v4420_v43 }
 0x179   : > { %v967_v42 = vshll.u32 %v4774_v17, %v965_v18  ;;  %v1113_v61 = vshrl.u32 %v1112_v46, 5  ;;  %v1119_v36 = vor.u32 %v1118_v48, %v1117_v50  ;;  %v1126_v12 = vshll.u32 %v6329_v27, %v1114_v16 }
 0x17a   : > { %vm680_vm0 = vcmp.eq.s32.totalorder %v4749_v59, 0  ;;  %v4889_v60 = vsub.s32 %v1057_v30, %v1060_v7  ;;  %v1122_v45 = vor.u32 %v1121_v13, %v1120_v29  ;;  %v1125_v38 = vor.u32 %v1124_v40, %v1123_v1 }
 0x17b   : > { %v1130_v14 = vshrl.u32 %v6330_v39, %v1115_v0  ;;  %v969_v62 = vor.u32 %v968_v25, %v967_v42  ;;  %v973_v31 = vor.u32 4788187, %v972_v4  ;;  %v1128_v52 = vor.u32 %v1127_v10, %v1126_v12 }
 0x17c   : > { %v1129_v28 = vshll.u32 %v6328_v55, %v1114_v16  ;;  %v878_v17 = vsel %vm793_vm8, %v877_v44, %v4640_v15  ;;  %3974 = vsinq.f32 %v879_v53  ;;  %v1063_v18 = vsub.s32 0, %v4889_v60 }
 0x17d   : > { %v4897_v46 = vshll.u32 %v1108_v8, 8  ;;  %v4899_v30 = vpop.eup %3968  ;;  %vm1132_vm2 = vcmp.lt.s32.totalorder %v1113_v61, 1  ;;  %vm1135_vm3 = vcmp.lt.s32.totalorder %v1113_v61, 4  ;;  %v1207_v13 = vshrl.u32 %v1206_v9, 23 }
 0x17e   : > { %6350 = vst [vmem:[#allocation26_spill] sm:$0xff] %v4899_v30  ;;  %v1131_v48 = vor.u32 %v1130_v14, %v1129_v28  ;;  %v4901_v25 = vpop.eup %3970  ;;  %v3732_v4 = vmin.u32 %v1063_v18, %v4889_v60  ;;  %v1116_v16 = vshrl.u32 %v6335_v63, %v1115_v0  ;;  %v1137_v50 = vsel %vm1135_vm3, %v1125_v38, 2102212464 }
 0x17f   : > { %6351 = vst [vmem:[#allocation27_spill] sm:$0xff] %v4901_v25  ;;  %v1140_v15 = vsel %vm1132_vm2, %v1119_v36, %v1122_v45  ;;  %v4907_v53 = vpop.eup %3972  ;;  %v974_v44 = vand.u32 2147483647, %v973_v31  ;;  %v976_v8 = vcvt.s32.f32 %v969_v62  ;;  %vm1134_vm4 = vcmp.lt.s32.totalorder %v1113_v61, 3 }
 0x180   : > { %v1141_v28 = vsel %vm1135_vm3, %v1128_v52, 920167782  ;;  %vm679_vm5 = vcmp.lt.s32.totalorder %v4749_v59, 2  ;;  %v1065_v14 = vclz %v3732_v4  ;;  %vm1133_vm7 = vcmp.lt.s32.totalorder %v1113_v61, 2 }
 0x181   : > { %v1136_v40 = vsel %vm1132_vm2, %v1116_v16, %v1119_v36  ;;  %v1142_v10 = vsel %vm1134_vm4, %v1125_v38, %v1141_v28  ;;  %vm896_vm8 = vcmp.lt.s32.totalorder %v4409_v58, 0  ;;  %v1138_v0 = vsel %vm1134_vm4, %v1122_v45, %v1137_v50 }
 0x182   : > { %v1143_v7 = vsel %vm1133_vm7, %v1140_v15, %v1142_v10  ;;  %v1144_v29 = vsel %vm1132_vm2, %v1122_v45, %v1125_v38  ;;  %v1145_v31 = vsel %vm1135_vm3, %v1131_v48, 1326507024  ;;  %vm786_vm9 = vcmp.eq.s32.totalorder %v4863_v33, 2 }
 0x183   : > { %v3733_v62 = vadd.s32 4294967294, %v1065_v14  ;;  %v1146_v1 = vsel %vm1134_vm4, %v1128_v52, %v1145_v31  ;;  %v4918_v9 = vmul.u32.u64.low %v4897_v46, %v1143_v7  ;;  %v4919_v42 = vmul.u32.u64.high %v4897_v46, %v1143_v7, %v4918_v9 }
 0x184   : > { %v6352_v36 = vxor.u32 2147483648, %v4824_v32  ;;  %vm783_vm10 = vcmp.eq.s32.totalorder %v4863_v33, 0  ;;  %v977_v45 = vmul.f32 %v976_v8, %v974_v44  ;;  %v1147_v38 = vsel %vm1133_vm7, %v1144_v29, %v1146_v1 }
 0x185   : > { %v3739_v18 = vadd.s32 4294967169, %v1207_v13  ;;  %v4931_v52 = vsel %vm4795_vm12, 0, %v878_v17  ;;  %v6354_v48 = vand.u32 2147483647, %v4409_v58  ;;  %vm3734_vm13 = vcmp.lt.s32.totalorder %v3733_v62, 0 }
 0x186   : > { %v682_v12 = vsel %vm680_vm0, %v4782_v22, %v6352_v36  ;;  %6353 = vst [vmem:[#allocation28_spill] sm:$0xff] %v4931_v52  ;;  %v4940_v16 = vmul.u32.u64.low %v4897_v46, %v1147_v38  ;;  %v4941_v50 = vmul.u32.u64.high %v4897_v46, %v1147_v38, %v4940_v16  ;;  %v6249_v15 = vxor.u32 2147483648, %v4899_v30  ;;  %v4945_v20 = vpop.eup %3974 }
 0x187   : > { %vm4935_vm11 = vcmp.le.f32.partialorder %v6354_v48, 0.7853982  ;;  %v1068_v44 = vsel %vm3734_vm13, 0, %v3733_v62  ;;  %v1139_v13 = vsel %vm1133_vm7, %v1136_v40, %v1138_v0  ;;  %v1213_v8 = vadd.s32 1, %v3739_v18 }
 0x188   : > { %v6250_v17 = vxor.u32 2147483648, %v4901_v25  ;;  %v980_v28 = vsub.s32 4, %v4759_v23  ;;  %v1073_v14 = vsub.s32 4294967266, %v1068_v44  ;;  %v1158_v10 = vadd.s32 1, %v4919_v42 }
 0x189   : > { %v978_v7 = vxor.u32 2147483648, %v977_v45  ;;  %v1069_v29 = vsub.s32 32, %v1068_v44  ;;  %v6251_v31 = vand.u32 2147483647, %v4420_v43  ;;  %vm1214_vm12 = vcmp.gt.s32.totalorder %v1213_v8, 0 }
 0x18a   : > { %v1074_v1 = vadd.s32 127, %v1073_v14  ;;  %v1155_v62 = vmul.u32 %v4897_v46, %v1139_v13  ;;  %vm1157_vm14 = vc.u32 %v4941_v50, %v4918_v9  ;;  %v1309_v61 = vand.u32 2139095040, %v4427_v2 }
 0x18b   : > { %v4958_v40 = vsel %vm679_vm5, %v682_v12, %v4872_v34  ;;  %v1053_v0 = vadd.s32 %v4802_v56, %v4808_v3  ;;  %v1159_v36 = vsel %vm1157_vm14, %v1158_v10, %v4919_v42  ;;  %v1215_v38 = vsel %vm1214_vm12, %v1213_v8, 0 }
 0x18c   : > { %v4964_v18 = vand.u32 3, %v4931_v52  ;;  %v981_v46 = vsel %vm896_vm8, %v980_v28, %v4759_v23  ;;  %v1075_v48 = vshll.u32 %v1074_v1, 23  ;;  %v1160_v16 = vadd.s32 %v1159_v36, %v1155_v62 }
 0x18d   : > { %v4974_v59 = vsel %vm786_vm9, %v6249_v15, %v4901_v25  ;;  %v1071_v56 = vshrl.u32 %v1053_v0, %v1069_v29  ;;  %v1210_v3 = vand.u32 8388607, %v6251_v31  ;;  %v1217_v34 = vand.u32 31, %v1215_v38 }
 0x18e   : > { %v4983_v23 = vsel %vm783_vm10, %v4899_v30, %v6250_v17  ;;  %v979_v42 = vsel %vm896_vm8, %v978_v7, %v977_v45  ;;  %v1161_v12 = vadd.s32 536870912, %v1160_v16  ;;  %v1310_v13 = vshrl.u32 %v1309_v61, 23 }
 0x18f   : > { %v4989_v8 = vsel %vm4935_vm11, 0, %v981_v46  ;;  %v1070_v28 = vshll.u32 %v4889_v60, %v1068_v44  ;;  %v1218_v14 = vsub.s32 32, %v1217_v34  ;;  %v1076_v62 = vor.u32 4788187, %v1075_v48 }
 0x190   : > { %v4995_v0 = vshrl.u32 %v1161_v12, 30  ;;  %v5000_v45 = vsel %vm4935_vm11, %v4409_v58, %v979_v42  ;;  %v1211_v61 = vor.u32 8388608, %v1210_v3  ;;  %v3743_v15 = vadd.s32 4294967169, %v1310_v13 }
 0x191   : > { %v1072_v7 = vor.u32 %v1071_v56, %v1070_v28  ;;  %v1221_v36 = vshrl.u32 %v6327_v54, %v1218_v14  ;;  %v1224_v44 = vshrl.u32 %v6340_v19, %v1218_v14  ;;  %v1227_v46 = vshrl.u32 %v6329_v27, %v1218_v14 }
 0x192   : > { %v1163_v60 = vshll.u32 %v4995_v0, 30  ;;  %v1216_v17 = vshrl.u32 %v1215_v38, 5  ;;  %v1220_v48 = vshll.u32 %v6335_v63, %v1217_v34  ;;  %v1223_v12 = vshll.u32 %v6327_v54, %v1217_v34 }
 0x193   : > { %v1230_v4 = vshrl.u32 %v6328_v55, %v1218_v14  ;;  %v1077_v42 = vand.u32 2147483647, %v1076_v62  ;;  %v1226_v56 = vshll.u32 %v6340_v19, %v1217_v34  ;;  %v1229_v3 = vshll.u32 %v6329_v27, %v1217_v34 }
 0x194   : > { %v5009_v31 = vsub.s32 %v1160_v16, %v1163_v60  ;;  %v1079_v28 = vcvt.s32.f32 %v1072_v7  ;;  %v1222_v10 = vor.u32 %v1221_v36, %v1220_v48  ;;  %v1232_v29 = vshll.u32 %v6328_v55, %v1217_v34 }
 0x195   : > { %v1233_v13 = vshrl.u32 %v6330_v39, %v1218_v14  ;;  %vm782_vm15 = vcmp.lt.s32.totalorder %v4863_v33, 2  ;;  %v1225_v1 = vor.u32 %v1224_v44, %v1223_v12  ;;  %v1228_v30 = vor.u32 %v1227_v46, %v1226_v56 }
 0x196   : > { %v1166_v38 = vsub.s32 0, %v5009_v31  ;;  %v1231_v25 = vor.u32 %v1230_v4, %v1229_v3  ;;  %vm889_vm1 = vcmp.eq.s32.totalorder %v4964_v18, 2  ;;  %3976 = vcosq.f32 %v5000_v45 }
 0x197   : > { %vm999_vm0 = vcmp.lt.s32.totalorder %v4413_v47, 0  ;;  %v1083_v16 = vsub.s32 4, %v4875_v26  ;;  %v1234_v62 = vor.u32 %v1233_v13, %v1232_v29  ;;  %v1251_v7 = vshll.u32 %v1211_v61, 8 }
 0x198   : > { %v1080_v34 = vmul.f32 %v1079_v28, %v1077_v42  ;;  %v3736_v36 = vmin.u32 %v1166_v38, %v5009_v31  ;;  %v1219_v60 = vshrl.u32 %v6335_v63, %v1218_v14  ;;  %v1316_v48 = vadd.s32 1, %v3743_v15 }
 0x199   : > { %vm886_vm2 = vcmp.eq.s32.totalorder %v4964_v18, 0  ;;  %vm1235_vm3 = vcmp.lt.s32.totalorder %v1216_v17, 1  ;;  %vm1236_vm4 = vcmp.lt.s32.totalorder %v1216_v17, 2  ;;  %vm1237_vm5 = vcmp.lt.s32.totalorder %v1216_v17, 3 }
 0x19a   : > { %vm1238_vm7 = vcmp.lt.s32.totalorder %v1216_v17, 4  ;;  %vm471_vm8 = vweird.f32 %v4198_v35  ;;  %v6357_v44 = vand.u32 2147483647, %v4413_v47  ;;  %v1168_v29 = vclz %v3736_v36 }
 0x19b   : > { %v1240_v61 = vsel %vm1238_vm7, %v1228_v30, 2102212464  ;;  %v1243_v12 = vsel %vm1235_vm3, %v1222_v10, %v1225_v1  ;;  %v1244_v4 = vsel %vm1238_vm7, %v1231_v25, 920167782  ;;  %vm574_vm10 = vweird.f32 %v4201_v37 }
 0x19c   : > { %vm5027_vm9 = vcmp.le.f32.partialorder %v6357_v44, 0.7853982  ;;  %v1239_v15 = vsel %vm1235_vm3, %v1219_v60, %v1222_v10  ;;  %v1245_v14 = vsel %vm1237_vm5, %v1228_v30, %v1244_v4  ;;  %v1247_v42 = vsel %vm1235_vm3, %v1225_v1, %v1228_v30 }
 0x19d   : > { %v1248_v56 = vsel %vm1238_vm7, %v1234_v62, 1326507024  ;;  %vm677_vm11 = vweird.f32 %v4290_v57  ;;  %vm6303_vm13 = vweird.f32 %v4364_v24  ;;  %v3737_v3 = vadd.s32 4294967294, %v1168_v29 }
 0x19e   : > { %v1241_v28 = vsel %vm1237_vm5, %v1225_v1, %v1240_v61  ;;  %v1246_v13 = vsel %vm1236_vm4, %v1243_v12, %v1245_v14  ;;  %v1249_v38 = vsel %vm1237_vm5, %v1231_v25, %v1248_v56  ;;  %v1081_v36 = vxor.u32 2147483648, %v1080_v34 }
 0x19f   : > { %v1250_v44 = vsel %vm1236_vm4, %v1247_v42, %v1249_v38  ;;  %v5039_v52 = vmul.u32.u64.low %v1251_v7, %v1246_v13  ;;  %v5040_v10 = vmul.u32.u64.high %v1251_v7, %v1246_v13, %v5039_v52  ;;  %vm3738_vm12 = vcmp.lt.s32.totalorder %v3737_v3, 0 }
 0x1a0   : > { %v5043_v30 = vmul.u32.u64.low %v1251_v7, %v1250_v44  ;;  %v5044_v62 = vmul.u32.u64.high %v1251_v7, %v1250_v44, %v5043_v30  ;;  %vm1317_vm14 = vcmp.gt.s32.totalorder %v1316_v48, 0  ;;  %v789_v1 = vsel %vm782_vm15, %v4983_v23, %v4974_v59  ;;  %v5065_v59 = vpop.eup %3976 }
 0x1a1   : > { %v5050_v60 = vsel %vm3738_vm12, 0, %v3737_v3  ;;  %v1242_v25 = vsel %vm1236_vm4, %v1239_v15, %v1241_v28  ;;  %v1318_v29 = vsel %vm1317_vm14, %v1316_v48, 0  ;;  %v6360_v61 = vxor.u32 2147483648, %v4907_v53 }
 0x1a2   : > { %3978 = vsinq.f32 %v5000_v45  ;;  %v5060_v4 = vand.u32 3, %v4989_v8  ;;  %v1084_v33 = vsel %vm999_vm0, %v1083_v16, %v4875_v26  ;;  %v1082_v17 = vsel %vm999_vm0, %v1081_v36, %v1080_v34 }
 0x1a3   : > { %v891_v12 = vsel %vm889_vm1, %v6360_v61, %v4945_v20  ;;  %v1176_v23 = vsub.s32 4294967266, %v5050_v60  ;;  %v1261_v48 = vadd.s32 1, %v5040_v10  ;;  %v1320_v15 = vand.u32 31, %v1318_v29 }
 0x1a4   : > { %v6361_v14 = vxor.u32 2147483648, %v4945_v20  ;;  %v1258_v42 = vmul.u32 %v1251_v7, %v1242_v25  ;;  %vm1260_vm15 = vc.u32 %v5044_v62, %v5039_v52  ;;  %v6362_v26 = vand.u32 2147483647, %v4427_v2 }
 0x1a5   : > { %v5083_v34 = vsel %vm471_vm8, nan, %v4814_v49  ;;  %v5087_v56 = vsel %vm5027_vm9, 0, %v1084_v33  ;;  %v1262_v3 = vsel %vm1260_vm15, %v1261_v48, %v5040_v10  ;;  %v1321_v28 = vsub.s32 32, %v1320_v15 }
 0x1a6   : > { %v888_v45 = vsel %vm886_vm2, %v4907_v53, %v6361_v14  ;;  %v1313_v16 = vand.u32 8388607, %v6362_v26  ;;  %6363 = vst [vmem:[#allocation29_spill] sm:$0xff] %v5083_v34  ;;  %v5093_v7 = vsel %vm574_vm10, nan, %v4852_v21  ;;  %vm885_vm1 = vcmp.lt.s32.totalorder %v4964_v18, 2 }
 0x1a7   : > { %6364 = vst [vmem:[#allocation30_spill] sm:$0xff] %v5093_v7  ;;  %v1085_v13 = vsel %vm5027_vm9, %v4413_v47, %v1082_v17  ;;  %v1263_v49 = vadd.s32 %v1262_v3, %v1258_v42  ;;  %v5102_v38 = vsel %vm677_vm11, nan, %v4958_v40  ;;  %v5106_v36 = vsel %vm6303_vm13, nan, %v789_v1 }
 0x1a8   : > { %6365 = vst [vmem:[#allocation31_spill] sm:$0xff] %v5102_v38  ;;  %6366 = vst [vmem:[#allocation32_spill] sm:$0xff] %v5106_v36  ;;  %v5108_v44 = vsel %vm885_vm1, %v888_v45, %v891_v12  ;;  %v1177_v21 = vadd.s32 127, %v1176_v23  ;;  %vm992_vm0 = vcmp.eq.s32.totalorder %v5060_v4, 2  ;;  %v5112_v18 = vand.u32 3, %v5087_v56 }
 0x1a9   : > { %v1156_v46 = vadd.s32 %v4918_v9, %v4941_v50  ;;  %v1264_v10 = vadd.s32 536870912, %v1263_v49  ;;  %v1314_v30 = vor.u32 8388608, %v1313_v16  ;;  %3980 = vcosq.f32 %v1085_v13 }
 0x1aa   : > { %v1324_v25 = vshrl.u32 %v6327_v54, %v1321_v28  ;;  %v1327_v1 = vshrl.u32 %v6340_v19, %v1321_v28  ;;  %v1172_v61 = vsub.s32 32, %v5050_v60  ;;  %v1323_v33 = vshll.u32 %v6335_v63, %v1320_v15 }
 0x1ab   : > { %v5120_v12 = vshrl.u32 %v1264_v10, 30  ;;  %v1330_v17 = vshrl.u32 %v6329_v27, %v1321_v28  ;;  %v1178_v23 = vshll.u32 %v1177_v21, 23  ;;  %v1326_v9 = vshll.u32 %v6327_v54, %v1320_v15 }
 0x1ac   : > { %v1332_v50 = vshll.u32 %v6329_v27, %v1320_v15  ;;  %v1333_v48 = vshrl.u32 %v6328_v55, %v1321_v28  ;;  %v5127_v14 = vpop.eup %3978  ;;  %3982 = vsinq.f32 %v1085_v13  ;;  %v1319_v42 = vshrl.u32 %v1318_v29, 5 }
 0x1ad   : > { %v1266_v45 = vshll.u32 %v5120_v12, 30  ;;  %v1329_v26 = vshll.u32 %v6340_v19, %v1320_v15  ;;  %v1325_v16 = vor.u32 %v1324_v25, %v1323_v33  ;;  %v1328_v3 = vor.u32 %v1327_v1, %v1326_v9 }
 0x1ae   : > { %v1334_v10 = vor.u32 %v1333_v48, %v1332_v50  ;;  %v1336_v40 = vshrl.u32 %v6330_v39, %v1321_v28  ;;  %v1174_v21 = vshrl.u32 %v1156_v46, %v1172_v61  ;;  %v1335_v7 = vshll.u32 %v6328_v55, %v1320_v15 }
 0x1af   : > { %v5132_v36 = vsub.s32 %v1263_v49, %v1266_v45  ;;  %v1331_v38 = vor.u32 %v1330_v17, %v1329_v26  ;;  %v6260_v34 = vxor.u32 2147483648, %v5127_v14  ;;  %v1173_v13 = vshll.u32 %v5009_v31, %v5050_v60 }
 0x1b0   : > { %v1179_v24 = vor.u32 4788187, %v1178_v23  ;;  %v5138_v29 = vshll.u32 %v1314_v30, 8  ;;  %v1337_v1 = vor.u32 %v1336_v40, %v1335_v7  ;;  %vm1338_vm2 = vcmp.lt.s32.totalorder %v1319_v42, 1 }
 0x1b1   : > { %v1269_v25 = vsub.s32 0, %v5132_v36  ;;  %vm1341_vm3 = vcmp.lt.s32.totalorder %v1319_v42, 4  ;;  %v6367_v49 = vxor.u32 2147483648, %v5065_v59  ;;  %v1322_v15 = vshrl.u32 %v6335_v63, %v1321_v28 }
 0x1b2   : > { %v1346_v61 = vsel %vm1338_vm2, %v1325_v16, %v1328_v3  ;;  %v1347_v31 = vsel %vm1341_vm3, %v1334_v10, 920167782  ;;  %v1175_v60 = vor.u32 %v1174_v21, %v1173_v13  ;;  %vm1340_vm4 = vcmp.lt.s32.totalorder %v1319_v42, 3 }
 0x1b3   : > { %v5146_v46 = vsel %vm992_vm0, %v6367_v49, %v5127_v14  ;;  %v3740_v30 = vmin.u32 %v1269_v25, %v5132_v36  ;;  %v1343_v7 = vsel %vm1341_vm3, %v1331_v38, 2102212464  ;;  %v5153_v40 = vpop.eup %3980  ;;  %v1180_v33 = vand.u32 2147483647, %v1179_v24 }
 0x1b4   : > { %6368 = vst [vmem:[#allocation33_spill] sm:$0xff] %v5153_v40  ;;  %vm1339_vm5 = vcmp.lt.s32.totalorder %v1319_v42, 2  ;;  %v1342_v17 = vsel %vm1338_vm2, %v1322_v15, %v1325_v16  ;;  %v1348_v23 = vsel %vm1340_vm4, %v1331_v38, %v1347_v31  ;;  %vm989_vm7 = vcmp.eq.s32.totalorder %v5060_v4, 0 }
 0x1b5   : > { %vm1102_vm9 = vcmp.lt.s32.totalorder %v4417_v11, 0  ;;  %v1271_v28 = vclz %v3740_v30  ;;  %v1349_v9 = vsel %vm1339_vm5, %v1346_v61, %v1348_v23  ;;  %v1350_v50 = vsel %vm1338_vm2, %v1328_v3, %v1331_v38 }
 0x1b6   : > { %v1351_v48 = vsel %vm1341_vm3, %v1337_v1, 1326507024  ;;  %vm1095_vm12 = vcmp.eq.s32.totalorder %v5112_v18, 2  ;;  %v1344_v45 = vsel %vm1340_vm4, %v1328_v3, %v1343_v7  ;;  %v5167_v16 = vpop.eup %3982  ;;  %vm1092_vm14 = vcmp.eq.s32.totalorder %v5112_v18, 0 }
 0x1b7   : > { %v1352_v26 = vsel %vm1340_vm4, %v1334_v10, %v1351_v48  ;;  %v5163_v24 = vmul.u32.u64.low %v5138_v29, %v1349_v9  ;;  %v5164_v21 = vmul.u32.u64.high %v5138_v29, %v1349_v9, %v5163_v24  ;;  %6369 = vst [vmem:[#allocation34_spill] sm:$0xff] %v5167_v16  ;;  %v1186_v13 = vsub.s32 4, %v4995_v0 }
 0x1b8   : > { %vm1205_vm15 = vcmp.lt.s32.totalorder %v4420_v43, 0  ;;  %v3741_v38 = vadd.s32 4294967294, %v1271_v28  ;;  %v1353_v25 = vsel %vm1339_vm5, %v1350_v50, %v1352_v26  ;;  %v1412_v1 = vand.u32 2139095040, %v4433_v41 }
 0x1b9   : > { %v1182_v3 = vcvt.s32.f32 %v1175_v60  ;;  %v5175_v10 = vmul.u32.u64.low %v5138_v29, %v1353_v25  ;;  %v5176_v49 = vmul.u32.u64.high %v5138_v29, %v1353_v25, %v5175_v10  ;;  %v6261_v15 = vand.u32 2147483647, %v4433_v41 }
 0x1ba   : > { %v1259_v61 = vadd.s32 %v5039_v52, %v5044_v62  ;;  %vm3742_vm1 = vcmp.lt.s32.totalorder %v3741_v38, 0  ;;  %v1345_v31 = vsel %vm1339_vm5, %v1342_v17, %v1344_v45  ;;  %v1413_v30 = vshrl.u32 %v1412_v1, 23 }
 0x1bb   : > { %vm6290_vm0 = vweird.f32 %v4405_v6  ;;  %vm988_vm2 = vcmp.lt.s32.totalorder %v5060_v4, 2  ;;  %v6258_v7 = vxor.u32 2147483648, %v5153_v40  ;;  %v6370_v60 = vand.u32 2147483647, %v4417_v11 }
 0x1bc   : > { %v1183_v28 = vmul.f32 %v1182_v3, %v1180_v33  ;;  %v1274_v9 = vsel %vm3742_vm1, 0, %v3741_v38  ;;  %v1364_v52 = vadd.s32 1, %v5164_v21  ;;  %v6259_v62 = vxor.u32 2147483648, %v5167_v16 }
 0x1bd   : > { %vm5187_vm3 = vcmp.le.f32.partialorder %v6370_v60, 0.7853982  ;;  %v6373_v42 = vand.u32 2147483647, %v4420_v43  ;;  %v1275_v50 = vsub.s32 32, %v1274_v9  ;;  %v1279_v48 = vsub.s32 4294967266, %v1274_v9 }
 0x1be   : > { %v3747_v45 = vadd.s32 4294967169, %v1413_v30  ;;  %v1289_v26 = vsub.s32 4, %v5120_v12  ;;  %v1361_v25 = vmul.u32 %v5138_v29, %v1345_v31  ;;  %vm1363_vm5 = vc.u32 %v5176_v49, %v5163_v24 }
 0x1bf   : > { %vm5195_vm4 = vcmp.le.f32.partialorder %v6373_v42, 0.7853982  ;;  %v1515_v33 = vand.u32 2139095040, %v4437_v51  ;;  %v1277_v38 = vshrl.u32 %v1259_v61, %v1275_v50  ;;  %v1280_v1 = vadd.s32 127, %v1279_v48 }
 0x1c0   : > { %v1365_v3 = vsel %vm1363_vm5, %v1364_v52, %v5164_v21  ;;  %v1419_v10 = vadd.s32 1, %v3747_v45  ;;  %v991_v30 = vsel %vm989_vm7, %v5065_v59, %v6260_v34  ;;  %v1184_v60 = vxor.u32 2147483648, %v1183_v28 }
 0x1c1   : > { %v1187_v29 = vsel %vm1102_vm9, %v1186_v13, %v4995_v0  ;;  %v1366_v31 = vadd.s32 %v1365_v3, %v1361_v25  ;;  %v1097_v61 = vsel %vm1095_vm12, %v6258_v7, %v5167_v16  ;;  %v1276_v21 = vshll.u32 %v5132_v36, %v1274_v9 }
 0x1c2   : > { %v1281_v52 = vshll.u32 %v1280_v1, 23  ;;  %vm1420_vm1 = vcmp.gt.s32.totalorder %v1419_v10, 0  ;;  %v1094_v42 = vsel %vm1092_vm14, %v5153_v40, %v6259_v62  ;;  %v1290_v0 = vsel %vm1205_vm15, %v1289_v26, %v5120_v12 }
 0x1c3   : > { %v1367_v13 = vadd.s32 536870912, %v1366_v31  ;;  %v1421_v50 = vsel %vm1420_vm1, %v1419_v10, 0  ;;  %v1278_v48 = vor.u32 %v1277_v38, %v1276_v21  ;;  %v1416_v25 = vand.u32 8388607, %v6261_v15 }
 0x1c4   : > { %v1282_v45 = vor.u32 4788187, %v1281_v52  ;;  %v1516_v36 = vshrl.u32 %v1515_v33, 23  ;;  %vm1091_vm7 = vcmp.lt.s32.totalorder %v5112_v18, 2  ;;  %v1185_v9 = vsel %vm1102_vm9, %v1184_v60, %v1183_v28 }
 0x1c5   : > { %v5232_v1 = vshrl.u32 %v1367_v13, 30  ;;  %v1423_v3 = vand.u32 31, %v1421_v50  ;;  %v5237_v12 = vsel %vm6290_vm0, nan, %v5108_v44  ;;  %v5242_v26 = vsel %vm988_vm2, %v991_v30, %v5146_v46 }
 0x1c6   : > { %6376 = vst [vmem:[#allocation35_spill] sm:$0xff] %v5237_v12  ;;  %v5244_v38 = vsel %vm1091_vm7, %v1094_v42, %v1097_v61  ;;  %v5248_v18 = vsel %vm5187_vm3, 0, %v1187_v29  ;;  %v1283_v28 = vand.u32 2147483647, %v1282_v45  ;;  %v5252_v33 = vsel %vm5195_vm4, 0, %v1290_v0 }
 0x1c7   : > { %6377 = vst [vmem:[#allocation36_spill] sm:$0xff] %v5252_v33  ;;  %v1369_v10 = vshll.u32 %v5232_v1, 30  ;;  %v1424_v44 = vsub.s32 32, %v1423_v3  ;;  %v1188_v4 = vsel %vm5187_vm3, %v4417_v11, %v1185_v9  ;;  %v1285_v46 = vcvt.s32.f32 %v1278_v48 }
 0x1c8   : > { %v1417_v30 = vor.u32 8388608, %v1416_v25  ;;  %v3751_v60 = vadd.s32 4294967169, %v1516_v36  ;;  %v5260_v21 = vshrl.u32 %v1421_v50, 5  ;;  %v1426_v29 = vshll.u32 %v6335_v63, %v1423_v3 }
 0x1c9   : > { %v5258_v61 = vsub.s32 %v1366_v31, %v1369_v10  ;;  %v1427_v52 = vshrl.u32 %v6327_v54, %v1424_v44  ;;  %v1429_v42 = vshll.u32 %v6327_v54, %v1423_v3  ;;  %v1430_v0 = vshrl.u32 %v6340_v19, %v1424_v44 }
 0x1ca   : > { %v1432_v13 = vshll.u32 %v6340_v19, %v1423_v3  ;;  %v1433_v23 = vshrl.u32 %v6329_v27, %v1424_v44  ;;  %3984 = vcosq.f32 %v1188_v4  ;;  %v1286_v48 = vmul.f32 %v1285_v46, %v1283_v28 }
 0x1cb   : > { %v1372_v45 = vsub.s32 0, %v5258_v61  ;;  %v1436_v31 = vshrl.u32 %v6328_v55, %v1424_v44  ;;  %v1428_v50 = vor.u32 %v1427_v52, %v1426_v29  ;;  %v1431_v25 = vor.u32 %v1430_v0, %v1429_v42 }
 0x1cc   : > { %v1434_v36 = vor.u32 %v1433_v23, %v1432_v13  ;;  %v1435_v9 = vshll.u32 %v6329_v27, %v1423_v3  ;;  %3986 = vsinq.f32 %v1188_v4  ;;  %v5272_v7 = vshll.u32 %v1417_v30, 8 }
 0x1cd   : > { %v3744_v10 = vmin.u32 %v1372_v45, %v5258_v61  ;;  %v1522_v62 = vadd.s32 1, %v3751_v60  ;;  %v1438_v15 = vshll.u32 %v6328_v55, %v1423_v3  ;;  %v1439_v28 = vshrl.u32 %v6330_v39, %v1424_v44 }
 0x1ce   : > { %v1437_v34 = vor.u32 %v1436_v31, %v1435_v9  ;;  %vm1441_vm9 = vcmp.lt.s32.totalorder %v5260_v21, 1  ;;  %vm6289_vm12 = vweird.f32 %v4409_v58  ;;  %v1425_v29 = vshrl.u32 %v6335_v63, %v1424_v44 }
 0x1cf   : > { %v1374_v46 = vclz %v3744_v10  ;;  %vm1442_vm14 = vcmp.lt.s32.totalorder %v5260_v21, 2  ;;  %vm1444_vm2 = vcmp.lt.s32.totalorder %v5260_v21, 4  ;;  %vm6264_vm3 = vweird.f32 %v4413_v47 }
 0x1d0   : > { %v1287_v4 = vxor.u32 2147483648, %v1286_v48  ;;  %v1440_v30 = vor.u32 %v1439_v28, %v1438_v15  ;;  %v1446_v60 = vsel %vm1444_vm2, %v1434_v36, 2102212464  ;;  %v1449_v52 = vsel %vm1441_vm9, %v1428_v50, %v1431_v25 }
 0x1d1   : > { %v3745_v3 = vadd.s32 4294967294, %v1374_v46  ;;  %vm1443_vm5 = vcmp.lt.s32.totalorder %v5260_v21, 3  ;;  %v1450_v42 = vsel %vm1444_vm2, %v1437_v34, 920167782  ;;  %v1453_v0 = vsel %vm1441_vm9, %v1431_v25, %v1434_v36 }
 0x1d2   : > { %v1445_v13 = vsel %vm1441_vm9, %v1425_v29, %v1428_v50  ;;  %v1451_v23 = vsel %vm1443_vm5, %v1434_v36, %v1450_v42  ;;  %v1454_v45 = vsel %vm1444_vm2, %v1440_v30, 1326507024  ;;  %vm1523_vm1 = vcmp.gt.s32.totalorder %v1522_v62, 0 }
 0x1d3   : > { %vm3746_vm7 = vcmp.lt.s32.totalorder %v3745_v3, 0  ;;  %v1447_v44 = vsel %vm1443_vm5, %v1431_v25, %v1446_v60  ;;  %v1452_v31 = vsel %vm1442_vm14, %v1449_v52, %v1451_v23  ;;  %v1455_v9 = vsel %vm1443_vm5, %v1437_v34, %v1454_v45 }
 0x1d4   : > { %v1377_v10 = vsel %vm3746_vm7, 0, %v3745_v3  ;;  %v1456_v15 = vsel %vm1442_vm14, %v1453_v0, %v1455_v9  ;;  %v5288_v28 = vmul.u32.u64.low %v5272_v7, %v1452_v31  ;;  %v5289_v46 = vmul.u32.u64.high %v5272_v7, %v1452_v31, %v5288_v28  ;;  %v5292_v12 = vpop.eup %3984 }
 0x1d5   : > { %6378 = vst [vmem:[#allocation37_spill] sm:$0xff] %v5292_v12  ;;  %v1362_v50 = vadd.s32 %v5163_v24, %v5176_v49  ;;  %v1378_v36 = vsub.s32 32, %v1377_v10  ;;  %v1382_v25 = vsub.s32 4294967266, %v1377_v10  ;;  %v1524_v29 = vsel %vm1523_vm1, %v1522_v62, 0 }
 0x1d6   : > { %v5297_v30 = vmul.u32.u64.low %v5272_v7, %v1456_v15  ;;  %v5298_v34 = vmul.u32.u64.high %v5272_v7, %v1456_v15, %v5297_v30  ;;  %v6262_v60 = vand.u32 2147483647, %v4437_v51  ;;  %v1526_v52 = vand.u32 31, %v1524_v29  ;;  %v5301_v3 = vpop.eup %3986 }
 0x1d7   : > { %6379 = vst [vmem:[#allocation38_spill] sm:$0xff] %v5301_v3  ;;  %v1379_v42 = vshll.u32 %v5258_v61, %v1377_v10  ;;  %v1380_v0 = vshrl.u32 %v1362_v50, %v1378_v36  ;;  %v1383_v23 = vadd.s32 127, %v1382_v25  ;;  %v1448_v45 = vsel %vm1442_vm14, %v1445_v13, %v1447_v44 }
 0x1d8   : > { %v5309_v24 = vsel %vm6289_vm12, nan, %v5242_v26  ;;  %v1288_v49 = vsel %vm1205_vm15, %v1287_v4, %v1286_v48  ;;  %v1467_v62 = vadd.s32 1, %v5289_v46  ;;  %v1527_v31 = vsub.s32 32, %v1526_v52 }
 0x1d9   : > { %6380 = vst [vmem:[#allocation39_spill] sm:$0xff] %v5309_v24  ;;  %v5317_v61 = vsel %vm6264_vm3, nan, %v5244_v38  ;;  %v5320_v9 = vand.u32 3, %v5248_v18  ;;  %v1381_v21 = vor.u32 %v1380_v0, %v1379_v42  ;;  %v1384_v13 = vshll.u32 %v1383_v23, 23 }
 0x1da   : > { %6381 = vst [vmem:[#allocation40_spill] sm:$0xff] %v5317_v61  ;;  %v5324_v26 = vand.u32 3, %v5252_v33  ;;  %vm1308_vm15 = vcmp.lt.s32.totalorder %v4427_v2, 0  ;;  %v1464_v48 = vmul.u32 %v5272_v7, %v1448_v45  ;;  %vm1466_vm9 = vc.u32 %v5298_v34, %v5288_v28 }
 0x1db   : > { %v1291_v38 = vsel %vm5195_vm4, %v4420_v43, %v1288_v49  ;;  %v1385_v4 = vor.u32 4788187, %v1384_v13  ;;  %v1468_v10 = vsel %vm1466_vm9, %v1467_v62, %v5289_v46  ;;  %v1519_v15 = vand.u32 8388607, %v6262_v60 }
 0x1dc   : > { %v6382_v50 = vand.u32 2147483647, %v4427_v2  ;;  %v1469_v7 = vadd.s32 %v1468_v10, %v1464_v48  ;;  %v1529_v25 = vshll.u32 %v6335_v63, %v1526_v52  ;;  %v1530_v30 = vshrl.u32 %v6327_v54, %v1527_v31 }
 0x1dd   : > { %v1533_v17 = vshrl.u32 %v6340_v19, %v1527_v31  ;;  %v1386_v42 = vand.u32 2147483647, %v1385_v4  ;;  %v1388_v0 = vcvt.s32.f32 %v1381_v21  ;;  %v1532_v46 = vshll.u32 %v6327_v54, %v1526_v52 }
 0x1de   : > { %vm5338_vm14 = vcmp.le.f32.partialorder %v6382_v50, 0.7853982  ;;  %v1536_v23 = vshrl.u32 %v6329_v27, %v1527_v31  ;;  %v1470_v45 = vadd.s32 536870912, %v1469_v7  ;;  %v5347_v49 = vshrl.u32 %v1524_v29, 5 }
 0x1df   : > { %v1535_v62 = vshll.u32 %v6340_v19, %v1526_v52  ;;  %v1538_v13 = vshll.u32 %v6329_v27, %v1526_v52  ;;  %vm1198_vm4 = vcmp.eq.s32.totalorder %v5320_v9, 2  ;;  %v1389_v48 = vmul.f32 %v1388_v0, %v1386_v42 }
 0x1e0   : > { %v1531_v10 = vor.u32 %v1530_v30, %v1529_v25  ;;  %v1534_v50 = vor.u32 %v1533_v17, %v1532_v46  ;;  %v1539_v60 = vshrl.u32 %v6328_v55, %v1527_v31  ;;  %vm1195_vm2 = vcmp.eq.s32.totalorder %v5320_v9, 0 }
 0x1e1   : > { %3988 = vcosq.f32 %v1291_v38  ;;  %v5354_v21 = vshrl.u32 %v1470_v45, 30  ;;  %v1520_v4 = vor.u32 8388608, %v1519_v15  ;;  %v1542_v29 = vshrl.u32 %v6330_v39, %v1527_v31 }
 0x1e2   : > { %v1390_v44 = vxor.u32 2147483648, %v1389_v48  ;;  %v1537_v61 = vor.u32 %v1536_v23, %v1535_v62  ;;  %v1540_v24 = vor.u32 %v1539_v60, %v1538_v13  ;;  %v1541_v47 = vshll.u32 %v6328_v55, %v1526_v52 }
 0x1e3   : > { %3990 = vsinq.f32 %v1291_v38  ;;  %v1472_v42 = vshll.u32 %v5354_v21, 30  ;;  %vm1544_vm5 = vcmp.lt.s32.totalorder %v5347_v49, 1  ;;  %vm1547_vm1 = vcmp.lt.s32.totalorder %v5347_v49, 4 }
 0x1e4   : > { %vm1194_vm7 = vcmp.lt.s32.totalorder %v5320_v9, 2  ;;  %v1391_v25 = vsel %vm1308_vm15, %v1390_v44, %v1389_v48  ;;  %v1543_v15 = vor.u32 %v1542_v29, %v1541_v47  ;;  %v1552_v30 = vsel %vm1544_vm5, %v1531_v10, %v1534_v50 }
 0x1e5   : > { %v1553_v60 = vsel %vm1547_vm1, %v1540_v24, 920167782  ;;  %v6265_v52 = vxor.u32 2147483648, %v5301_v3  ;;  %v1392_v38 = vsub.s32 4, %v5232_v1  ;;  %v5370_v17 = vsub.s32 %v1469_v7, %v1472_v42 }
 0x1e6   : > { %vm1546_vm9 = vcmp.lt.s32.totalorder %v5347_v49, 3  ;;  %v1394_v0 = vsel %vm5338_vm14, %v4427_v2, %v1391_v25  ;;  %vm1545_vm3 = vcmp.lt.s32.totalorder %v5347_v49, 2  ;;  %v1560_v44 = vshll.u32 %v1520_v4, 8 }
 0x1e7   : > { %v1554_v47 = vsel %vm1546_vm9, %v1537_v61, %v1553_v60  ;;  %v1475_v46 = vsub.s32 0, %v5370_v17  ;;  %v1528_v23 = vshrl.u32 %v6335_v63, %v1527_v31  ;;  %v1549_v7 = vsel %vm1547_vm1, %v1537_v61, 2102212464 }
 0x1e8   : > { %v1555_v45 = vsel %vm1545_vm3, %v1552_v30, %v1554_v47  ;;  %v1556_v62 = vsel %vm1544_vm5, %v1534_v50, %v1537_v61  ;;  %v1557_v13 = vsel %vm1547_vm1, %v1543_v15, 1326507024  ;;  %v6385_v4 = vxor.u32 2147483648, %v5292_v12 }
 0x1e9   : > { %v5389_v48 = vmul.u32.u64.low %v1560_v44, %v1555_v45  ;;  %v5390_v29 = vmul.u32.u64.high %v1560_v44, %v1555_v45, %v5389_v48  ;;  %v1393_v42 = vsel %vm1308_vm15, %v1392_v38, %v5232_v1  ;;  %3992 = vcosq.f32 %v1394_v0 }
 0x1ea   : > { %v1200_v31 = vsel %vm1198_vm4, %v6385_v4, %v5301_v3  ;;  %v3748_v61 = vmin.u32 %v1475_v46, %v5370_v17  ;;  %v1197_v25 = vsel %vm1195_vm2, %v5292_v12, %v6265_v52  ;;  %3994 = vsinq.f32 %v1394_v0  ;;  %v6387_v46 = vld [vmem:[#allocation12_spill] sm:$0xff] }
 0x1eb   : > { %v1548_v15 = vsel %vm1544_vm5, %v1528_v23, %v1531_v10  ;;  %v1558_v30 = vsel %vm1546_vm9, %v1540_v24, %v1557_v13  ;;  %v5411_v60 = vpop.eup %3988  ;;  %v1550_v1 = vsel %vm1546_vm9, %v1534_v50, %v1549_v7  ;;  %v1618_v45 = vand.u32 2139095040, %v6387_v46 }
 0x1ec   : > { %6386 = vst [vmem:[#allocation41_spill] sm:$0xff] %v5411_v60  ;;  %v1477_v47 = vclz %v3748_v61  ;;  %v1559_v38 = vsel %vm1545_vm3, %v1556_v62, %v1558_v30  ;;  %vm1298_vm15 = vcmp.eq.s32.totalorder %v5324_v26, 0  ;;  %v5421_v0 = vsel %vm5338_vm14, 0, %v1393_v42  ;;  %v6390_v42 = vld [vmem:[#allocation13_spill] sm:$0xff] }
 0x1ed   : > { %6388 = vst [vmem:[#allocation12_spill] sm:$0xff] %v5421_v0  ;;  %vm1411_vm4 = vcmp.lt.s32.totalorder %v4433_v41, 0  ;;  %v5424_v24 = vmul.u32.u64.low %v1560_v44, %v1559_v38  ;;  %v5425_v10 = vmul.u32.u64.high %v1560_v44, %v1559_v38, %v5424_v24  ;;  %v5427_v23 = vpop.eup %3990  ;;  %v5431_v50 = vsel %vm1194_vm7, %v1197_v25, %v1200_v31 }
 0x1ee   : > { %6389 = vst [vmem:[#allocation42_spill] sm:$0xff] %v5427_v23  ;;  %vm1301_vm2 = vcmp.eq.s32.totalorder %v5324_v26, 2  ;;  %v3749_v7 = vadd.s32 4294967294, %v1477_v47  ;;  %v1619_v62 = vshrl.u32 %v1618_v45, 23  ;;  %v1551_v36 = vsel %vm1545_vm3, %v1548_v15, %v1550_v1 }
 0x1ef   : > { %v1570_v13 = vadd.s32 1, %v5390_v29  ;;  %v6275_v4 = vand.u32 2147483647, %v6387_v46  ;;  %v1721_v61 = vand.u32 2139095040, %v6390_v42  ;;  %vm1297_vm14 = vcmp.lt.s32.totalorder %v5324_v26, 2 }
 0x1f0   : > { %v5442_v9 = vand.u32 3, %v5421_v0  ;;  %v6391_v31 = vand.u32 2147483647, %v4433_v41  ;;  %vm3750_vm3 = vcmp.lt.s32.totalorder %v3749_v7, 0  ;;  %v3755_v49 = vadd.s32 4294967169, %v1619_v62 }
 0x1f1   : > { %v1465_v47 = vadd.s32 %v5288_v28, %v5298_v34  ;;  %v1480_v1 = vsel %vm3750_vm3, 0, %v3749_v7  ;;  %vm1569_vm1 = vc.u32 %v5425_v10, %v5389_v48  ;;  %v1495_v24 = vsub.s32 4, %v5354_v21 }
 0x1f2   : > { %vm5446_vm5 = vcmp.le.f32.partialorder %v6391_v31, 0.7853982  ;;  %v1481_v38 = vsub.s32 32, %v1480_v1  ;;  %v1485_v45 = vsub.s32 4294967266, %v1480_v1  ;;  %v1567_v52 = vmul.u32 %v1560_v44, %v1551_v36 }
 0x1f3   : > { %v1571_v31 = vsel %vm1569_vm1, %v1570_v13, %v5390_v29  ;;  %v1622_v30 = vand.u32 8388607, %v6275_v4  ;;  %v1625_v62 = vadd.s32 1, %v3755_v49  ;;  %v1722_v0 = vshrl.u32 %v1721_v61, 23  ;;  %v5459_v15 = vpop.eup %3992 }
 0x1f4   : > { %6394 = vst [vmem:[#allocation13_spill] sm:$0xff] %v5459_v15  ;;  %v1482_v28 = vshll.u32 %v5370_v17, %v1480_v1  ;;  %v1483_v34 = vshrl.u32 %v1465_v47, %v1481_v38  ;;  %v1486_v7 = vadd.s32 127, %v1485_v45  ;;  %v1572_v12 = vadd.s32 %v1571_v31, %v1567_v52  ;;  %v5462_v3 = vpop.eup %3994 }
 0x1f5   : > { %6395 = vst [vmem:[#allocation43_spill] sm:$0xff] %v5462_v3  ;;  %v6396_v58 = vxor.u32 2147483648, %v5427_v23  ;;  %v6397_v29 = vxor.u32 2147483648, %v5411_v60  ;;  %vm1401_vm7 = vcmp.eq.s32.totalorder %v5442_v9, 0  ;;  %vm1626_vm9 = vcmp.gt.s32.totalorder %v1625_v62, 0 }
 0x1f6   : > { %v1484_v17 = vor.u32 %v1483_v34, %v1482_v28  ;;  %v1487_v13 = vshll.u32 %v1486_v7, 23  ;;  %v1496_v52 = vsel %vm1411_vm4, %v1495_v24, %v5354_v21  ;;  %v1573_v61 = vadd.s32 536870912, %v1572_v12 }
 0x1f7   : > { %v1300_v44 = vsel %vm1298_vm15, %v5411_v60, %v6396_v58  ;;  %v1303_v36 = vsel %vm1301_vm2, %v6397_v29, %v5427_v23  ;;  %v6272_v49 = vxor.u32 2147483648, %v5459_v15  ;;  %v1623_v47 = vor.u32 8388608, %v1622_v30 }
 0x1f8   : > { %v1627_v58 = vsel %vm1626_vm9, %v1625_v62, 0  ;;  %v3759_v1 = vadd.s32 4294967169, %v1722_v0  ;;  %v6273_v38 = vxor.u32 2147483648, %v5462_v3  ;;  %v1488_v45 = vor.u32 4788187, %v1487_v13 }
 0x1f9   : > { %v5480_v31 = vshrl.u32 %v1573_v61, 30  ;;  %v6274_v29 = vand.u32 2147483647, %v6390_v42  ;;  %v5485_v28 = vsel %vm1297_vm14, %v1300_v44, %v1303_v36  ;;  %vm1404_vm15 = vcmp.eq.s32.totalorder %v5442_v9, 2 }
 0x1fa   : > { %v5490_v21 = vsel %vm5446_vm5, 0, %v1496_v52  ;;  %v1629_v30 = vand.u32 31, %v1627_v58  ;;  %v1489_v24 = vand.u32 2147483647, %v1488_v45  ;;  %v1491_v0 = vcvt.s32.f32 %v1484_v17 }
 0x1fb   : > { %v5494_v62 = vadd.s32 %v5389_v48, %v5425_v10  ;;  %v1575_v34 = vshll.u32 %v5480_v31, 30  ;;  %v5500_v26 = vsel %vm1404_vm15, %v6272_v49, %v5462_v3  ;;  %v5502_v44 = vshll.u32 %v1623_v47, 8 }
 0x1fc   : > { %v1630_v7 = vsub.s32 32, %v1629_v30  ;;  %v1728_v36 = vadd.s32 1, %v3759_v1  ;;  %v5509_v17 = vsel %vm1401_vm7, %v5459_v15, %v6273_v38  ;;  %v1492_v48 = vmul.f32 %v1491_v0, %v1489_v24 }
 0x1fd   : > { %v5511_v10 = vsub.s32 %v1572_v12, %v1575_v34  ;;  %v5515_v13 = vand.u32 8388607, %v6274_v29  ;;  %v5517_v52 = vshrl.u32 %v1627_v58, 5  ;;  %v1632_v61 = vshll.u32 %v6335_v63, %v1629_v30 }
 0x1fe   : > { %v1633_v47 = vshrl.u32 %v6327_v54, %v1630_v7  ;;  %v1636_v1 = vshrl.u32 %v6340_v19, %v1630_v7  ;;  %v1493_v45 = vxor.u32 2147483648, %v1492_v48  ;;  %v1635_v38 = vshll.u32 %v6327_v54, %v1629_v30 }
 0x1ff   : > { %v1578_v49 = vsub.s32 0, %v5511_v10  ;;  %v1639_v12 = vshrl.u32 %v6329_v27, %v1630_v7  ;;  %v1638_v24 = vshll.u32 %v6340_v19, %v1629_v30  ;;  %v1641_v0 = vshll.u32 %v6329_v27, %v1629_v30 }
 0x200   : > { %v1642_v58 = vshrl.u32 %v6328_v55, %v1630_v7  ;;  %vm1729_vm2 = vcmp.gt.s32.totalorder %v1728_v36, 0  ;;  %v1494_v34 = vsel %vm1411_vm4, %v1493_v45, %v1492_v48  ;;  %v1634_v4 = vor.u32 %v1633_v47, %v1632_v61 }
 0x201   : > { %v3752_v29 = vmin.u32 %v1578_v49, %v5511_v10  ;;  %v1637_v15 = vor.u32 %v1636_v1, %v1635_v38  ;;  %v1497_v3 = vsel %vm5446_vm5, %v4433_v41, %v1494_v34  ;;  %v1598_v60 = vsub.s32 4, %v5480_v31 }
 0x202   : > { %v1640_v23 = vor.u32 %v1639_v12, %v1638_v24  ;;  %v1643_v40 = vor.u32 %v1642_v58, %v1641_v0  ;;  %vm6302_vm14 = vweird.f32 %v4417_v11  ;;  %3996 = vcosq.f32 %v1497_v3 }
 0x203   : > { %v1580_v16 = vclz %v3752_v29  ;;  %v1644_v33 = vshll.u32 %v6328_v55, %v1629_v30  ;;  %v1645_v48 = vshrl.u32 %v6330_v39, %v1630_v7  ;;  %3998 = vsinq.f32 %v1497_v3 }
 0x204   : > { %v1631_v49 = vshrl.u32 %v6335_v63, %v1630_v7  ;;  %vm1647_vm4 = vcmp.lt.s32.totalorder %v5517_v52, 1  ;;  %vm1648_vm3 = vcmp.lt.s32.totalorder %v5517_v52, 2  ;;  %vm6293_vm5 = vweird.f32 %v4420_v43 }
 0x205   : > { %v3753_v25 = vadd.s32 4294967294, %v1580_v16  ;;  %v1646_v38 = vor.u32 %v1645_v48, %v1644_v33  ;;  %vm1650_vm1 = vcmp.lt.s32.totalorder %v5517_v52, 4  ;;  %v1655_v61 = vsel %vm1647_vm4, %v1634_v4, %v1637_v15 }
 0x206   : > { %vm1514_vm7 = vcmp.lt.s32.totalorder %v4437_v51, 0  ;;  %vm1649_vm9 = vcmp.lt.s32.totalorder %v5517_v52, 3  ;;  %v1652_v29 = vsel %vm1650_vm1, %v1640_v23, 2102212464  ;;  %v1656_v30 = vsel %vm1650_vm1, %v1643_v40, 920167782 }
 0x207   : > { %v1659_v3 = vsel %vm1647_vm4, %v1637_v15, %v1640_v23  ;;  %vm6292_vm15 = vweird.f32 %v4427_v2  ;;  %vm3754_vm12 = vcmp.lt.s32.totalorder %v3753_v25, 0  ;;  %v1651_v7 = vsel %vm1647_vm4, %v1631_v49, %v1634_v4 }
 0x208   : > { %v1657_v47 = vsel %vm1649_vm9, %v1640_v23, %v1656_v30  ;;  %v1660_v1 = vsel %vm1650_vm1, %v1646_v38, 1326507024  ;;  %v1583_v16 = vsel %vm3754_vm12, 0, %v3753_v25  ;;  %v1730_v12 = vsel %vm1729_vm2, %v1728_v36, 0 }
 0x209   : > { %v1658_v33 = vsel %vm1648_vm3, %v1655_v61, %v1657_v47  ;;  %v1661_v45 = vsel %vm1649_vm9, %v1643_v40, %v1660_v1  ;;  %v6398_v24 = vand.u32 2147483647, %v4437_v51  ;;  %v1584_v4 = vsub.s32 32, %v1583_v16 }
 0x20a   : > { %v1588_v58 = vsub.s32 4294967266, %v1583_v16  ;;  %v1653_v23 = vsel %vm1649_vm9, %v1637_v15, %v1652_v29  ;;  %v1662_v34 = vsel %vm1648_vm3, %v1659_v3, %v1661_v45  ;;  %v1585_v25 = vshll.u32 %v5511_v10, %v1583_v16 }
 0x20b   : > { %vm5555_vm0 = vcmp.le.f32.partialorder %v6398_v24, 0.7853982  ;;  %v5564_v48 = vmul.u32.u64.low %v5502_v44, %v1662_v34  ;;  %v5565_v49 = vmul.u32.u64.high %v5502_v44, %v1662_v34, %v5564_v48  ;;  %v1586_v38 = vshrl.u32 %v5494_v62, %v1584_v4 }
 0x20c   : > { %v5568_v40 = vmul.u32.u64.low %v5502_v44, %v1658_v33  ;;  %v5569_v36 = vmul.u32.u64.high %v5502_v44, %v1658_v33, %v5568_v40  ;;  %v1589_v61 = vadd.s32 127, %v1588_v58  ;;  %v1732_v30 = vand.u32 31, %v1730_v12  ;;  %v5583_v47 = vpop.eup %3996 }
 0x20d   : > { %v5577_v15 = vsel %vm6302_vm14, nan, %v5431_v50  ;;  %vm1400_vm12 = vcmp.lt.s32.totalorder %v5442_v9, 2  ;;  %v1654_v29 = vsel %vm1648_vm3, %v1651_v7, %v1653_v23  ;;  %v1726_v3 = vor.u32 8388608, %v5515_v13  ;;  %6402 = vst [vmem:[#allocation45_spill] sm:$0xff] %v5583_v47  ;;  %v5587_v33 = vpop.eup %3998  ;;  %v6405_v7 = vld [vmem:[#allocation14_spill] sm:$0xff] }
 0x20e   : > { %6401 = vst [vmem:[#allocation44_spill] sm:$0xff] %v5577_v15  ;;  %v1407_v10 = vsel %vm1400_vm12, %v5509_v17, %v5500_v26  ;;  %v1587_v62 = vor.u32 %v1586_v38, %v1585_v25  ;;  %v1590_v1 = vshll.u32 %v1589_v61, 23  ;;  %v1733_v16 = vsub.s32 32, %v1732_v30  ;;  %6403 = vst [vmem:[#allocation46_spill] sm:$0xff] %v5587_v33 }
 0x20f   : > { %v5592_v50 = vsel %vm6293_vm5, nan, %v5485_v28  ;;  %v5595_v9 = vand.u32 3, %v5490_v21  ;;  %vm1672_vm2 = vc.u32 %v5565_v49, %v5568_v40  ;;  %v1673_v13 = vadd.s32 1, %v5569_v36 }
 0x210   : > { %6404 = vst [vmem:[#allocation47_spill] sm:$0xff] %v5592_v50  ;;  %v1591_v52 = vor.u32 4788187, %v1590_v1  ;;  %v1599_v26 = vsel %vm1514_vm7, %v1598_v60, %v5480_v31  ;;  %v1670_v17 = vmul.u32 %v5502_v44, %v1654_v29  ;;  %v6291_v45 = vand.u32 2147483647, %v6405_v7 }
 0x211   : > { %v5607_v28 = vsel %vm6292_vm15, nan, %v1407_v10  ;;  %v1674_v24 = vsel %vm1672_vm2, %v1673_v13, %v5569_v36  ;;  %v1736_v4 = vshrl.u32 %v6327_v54, %v1733_v16  ;;  %v5611_v58 = vshll.u32 %v1726_v3, 8 }
 0x212   : > { %6406 = vst [vmem:[#allocation14_spill] sm:$0xff] %v5607_v28  ;;  %v1592_v23 = vand.u32 2147483647, %v1591_v52  ;;  %v1594_v34 = vcvt.s32.f32 %v1587_v62  ;;  %v1675_v48 = vadd.s32 %v1674_v24, %v1670_v17  ;;  %v1739_v25 = vshrl.u32 %v6340_v19, %v1733_v16 }
 0x213   : > { %v5616_v60 = vsel %vm5555_vm0, 0, %v1599_v26  ;;  %v5618_v31 = vshrl.u32 %v1730_v12, 5  ;;  %v1735_v44 = vshll.u32 %v6335_v63, %v1732_v30  ;;  %v1824_v38 = vand.u32 2139095040, %v6405_v7 }
 0x214   : > { %v1595_v36 = vmul.f32 %v1594_v34, %v1592_v23  ;;  %v1676_v61 = vadd.s32 536870912, %v1675_v48  ;;  %v1738_v29 = vshll.u32 %v6327_v54, %v1732_v30  ;;  %v1742_v3 = vshrl.u32 %v6329_v27, %v1733_v16 }
 0x215   : > { %vm1504_vm4 = vcmp.eq.s32.totalorder %v5595_v9, 0  ;;  %vm1507_vm3 = vcmp.eq.s32.totalorder %v5595_v9, 2  ;;  %vm1617_vm1 = vcmp.lt.s32.totalorder %v6387_v46, 0  ;;  %v1737_v10 = vor.u32 %v1736_v4, %v1735_v44 }
 0x216   : > { %v1741_v12 = vshll.u32 %v6340_v19, %v1732_v30  ;;  %v1744_v62 = vshll.u32 %v6329_v27, %v1732_v30  ;;  %v1745_v1 = vshrl.u32 %v6328_v55, %v1733_v16  ;;  %v1596_v13 = vxor.u32 2147483648, %v1595_v36 }
 0x217   : > { %v1677_v52 = vshrl.u32 %v1676_v61, 30  ;;  %v1740_v26 = vor.u32 %v1739_v25, %v1738_v29  ;;  %v1748_v17 = vshrl.u32 %v6330_v39, %v1733_v16  ;;  %v1747_v34 = vshll.u32 %v6328_v55, %v1732_v30 }
 0x218   : > { %v1746_v23 = vor.u32 %v1745_v1, %v1744_v62  ;;  %v5635_v28 = vand.u32 8388607, %v6291_v45  ;;  %vm1503_vm9 = vcmp.lt.s32.totalorder %v5595_v9, 2  ;;  %v6294_v4 = vxor.u32 2147483648, %v5587_v33 }
 0x219   : > { %v1597_v44 = vsel %vm1514_vm7, %v1596_v13, %v1595_v36  ;;  %v1678_v61 = vshll.u32 %v1677_v52, 30  ;;  %v1743_v25 = vor.u32 %v1742_v3, %v1741_v12  ;;  %v6407_v62 = vand.u32 2147483647, %v6387_v46 }
 0x21a   : > { %v1600_v29 = vsel %vm5555_vm0, %v4437_v51, %v1597_v44  ;;  %v1734_v1 = vshrl.u32 %v6335_v63, %v1733_v16  ;;  %v1749_v45 = vor.u32 %v1748_v17, %v1747_v34  ;;  %vm1750_vm2 = vcmp.lt.s32.totalorder %v5618_v31, 1 }
 0x21b   : > { %vm5646_vm12 = vcmp.le.f32.partialorder %v6407_v62, 0.7853982  ;;  %v5652_v24 = vsub.s32 %v1675_v48, %v1678_v61  ;;  %v1701_v36 = vsub.s32 4, %v1677_v52  ;;  %vm1753_vm7 = vcmp.lt.s32.totalorder %v5618_v31, 4 }
 0x21c   : > { %v1758_v0 = vsel %vm1750_vm2, %v1737_v10, %v1740_v26  ;;  %vm6301_vm0 = vweird.f32 %v4433_v41  ;;  %4000 = vcosq.f32 %v1600_v29  ;;  %vm1751_vm15 = vcmp.lt.s32.totalorder %v5618_v31, 2 }
 0x21d   : > { %vm1752_vm5 = vcmp.lt.s32.totalorder %v5618_v31, 3  ;;  %v1759_v3 = vsel %vm1753_vm7, %v1746_v23, 920167782  ;;  %4002 = vsinq.f32 %v1600_v29  ;;  %v1681_v16 = vsub.s32 0, %v5652_v24 }
 0x21e   : > { %v1755_v12 = vsel %vm1753_vm7, %v1743_v25, 2102212464  ;;  %v1760_v48 = vsel %vm1752_vm5, %v1743_v25, %v1759_v3  ;;  %v1762_v17 = vsel %vm1750_vm2, %v1740_v26, %v1743_v25  ;;  %v1763_v34 = vsel %vm1753_vm7, %v1749_v45, 1326507024 }
 0x21f   : > { %v1761_v13 = vsel %vm1751_vm15, %v1758_v0, %v1760_v48  ;;  %v1825_v44 = vshrl.u32 %v1824_v38, 23  ;;  %v1506_v61 = vsel %vm1504_vm4, %v5583_v47, %v6294_v4  ;;  %v6410_v29 = vxor.u32 2147483648, %v5583_v47 }
 0x220   : > { %v3756_v3 = vmin.u32 %v1681_v16, %v5652_v24  ;;  %v1702_v0 = vsel %vm1617_vm1, %v1701_v36, %v1677_v52  ;;  %v1764_v45 = vsel %vm1752_vm5, %v1746_v23, %v1763_v34  ;;  %v1754_v50 = vsel %vm1750_vm2, %v1734_v1, %v1737_v10 }
 0x221   : > { %v1509_v62 = vsel %vm1507_vm3, %v6410_v29, %v5587_v33  ;;  %v5683_v38 = vmul.u32.u64.low %v5611_v58, %v1761_v13  ;;  %v5684_v25 = vmul.u32.u64.high %v5611_v58, %v1761_v13, %v5683_v38  ;;  %v3763_v48 = vadd.s32 4294967169, %v1825_v44 }
 0x222   : > { %v1683_v4 = vclz %v3756_v3  ;;  %v1756_v29 = vsel %vm1752_vm5, %v1740_v26, %v1755_v12  ;;  %v1765_v16 = vsel %vm1751_vm15, %v1762_v17, %v1764_v45  ;;  %v1510_v52 = vsel %vm1503_vm9, %v1506_v61, %v1509_v62  ;;  %v6411_v12 = vld [vmem:[#allocation15_spill] sm:$0xff] }
 0x223   : > { %v5696_v23 = vmul.u32.u64.low %v5611_v58, %v1765_v16  ;;  %v5697_v36 = vmul.u32.u64.high %v5611_v58, %v1765_v16, %v5696_v23  ;;  %v1831_v13 = vadd.s32 1, %v3763_v48  ;;  %v5700_v34 = vand.u32 3, %v5616_v60 }
 0x224   : > { %v3757_v44 = vadd.s32 4294967294, %v1683_v4  ;;  %v5704_v10 = vsel %vm5646_vm12, 0, %v1702_v0  ;;  %v1829_v26 = vor.u32 8388608, %v5635_v28  ;;  %v1757_v1 = vsel %vm1751_vm15, %v1754_v50, %v1756_v29  ;;  %v6413_v50 = vld [vmem:[#allocation18_spill] sm:$0xff] }
 0x225   : > { %v1776_v9 = vadd.s32 1, %v5684_v25  ;;  %vm1832_vm5 = vcmp.gt.s32.totalorder %v1831_v13, 0  ;;  %v2017_v17 = vadd.s32 3, %v6411_v12  ;;  %v5713_v61 = vsel %vm6301_vm0, nan, %v1510_v52 }
 0x226   : > { %6412 = vst [vmem:[#allocation15_spill] sm:$0xff] %v5713_v61  ;;  %v1671_v4 = vadd.s32 %v5568_v40, %v5565_v49  ;;  %vm3758_vm4 = vcmp.lt.s32.totalorder %v3757_v44, 0  ;;  %v1833_v62 = vsel %vm1832_vm5, %v1831_v13, 0  ;;  %v5717_v3 = vpop.eup %4000  ;;  %v5720_v31 = vand.u32 3, %v5704_v10  ;;  %v6414_v13 = vld [vmem:[#allocation19_spill] sm:$0xff] }
 0x227   : > { %v1686_v28 = vsel %vm3758_vm4, 0, %v3757_v44  ;;  %vm1775_vm15 = vc.u32 %v5697_v36, %v5683_v38  ;;  %v2121_v0 = vadd.s32 3, %v6413_v50  ;;  %v5725_v45 = vpop.eup %4002  ;;  %v1773_v16 = vmul.u32 %v5611_v58, %v1757_v1 }
 0x228   : > { %v1687_v48 = vsub.s32 32, %v1686_v28  ;;  %v1691_v29 = vsub.s32 4294967266, %v1686_v28  ;;  %v5728_v49 = vshll.u32 %v1829_v26, 8  ;;  %vm1610_vm3 = vcmp.eq.s32.totalorder %v5700_v34, 2 }
 0x229   : > { %v1777_v40 = vsel %vm1775_vm15, %v1776_v9, %v5684_v25  ;;  %v1835_v52 = vand.u32 31, %v1833_v62  ;;  %v5732_v23 = vand.u32 3, %v2017_v17  ;;  %v5735_v44 = vadd.s32 3, %v6414_v13  ;;  %v6415_v25 = vld [vmem:[#allocation24_spill] sm:$0xff] }
 0x22a   : > { %vm1607_vm9 = vcmp.eq.s32.totalorder %v5700_v34, 0  ;;  %v1688_v12 = vshll.u32 %v5652_v24, %v1686_v28  ;;  %v1689_v50 = vshrl.u32 %v1671_v4, %v1687_v48  ;;  %v1692_v61 = vadd.s32 127, %v1691_v29 }
 0x22b   : > { %v1778_v15 = vadd.s32 %v1777_v40, %v1773_v16  ;;  %vm1720_vm2 = vcmp.lt.s32.totalorder %v6390_v42, 0  ;;  %v1836_v26 = vsub.s32 32, %v1835_v52  ;;  %v5741_v1 = vand.u32 3, %v2121_v0 }
 0x22c   : > { %v5744_v9 = vadd.s32 3, %v6415_v25  ;;  %v1690_v13 = vor.u32 %v1689_v50, %v1688_v12  ;;  %v1693_v41 = vshll.u32 %v1692_v61, 23  ;;  %v1834_v47 = vshrl.u32 %v1833_v62, 5 }
 0x22d   : > { %v1779_v2 = vadd.s32 536870912, %v1778_v15  ;;  %v1838_v24 = vshll.u32 %v6335_v63, %v1835_v52  ;;  %v1839_v4 = vshrl.u32 %v6327_v54, %v1836_v26  ;;  %v1842_v28 = vshrl.u32 %v6340_v19, %v1836_v26 }
 0x22e   : > { %v1694_v48 = vor.u32 4788187, %v1693_v41  ;;  %v1841_v0 = vshll.u32 %v6327_v54, %v1835_v52  ;;  %v1845_v16 = vshrl.u32 %v6329_v27, %v1836_v26  ;;  %v1697_v40 = vcvt.s32.f32 %v1690_v13 }
 0x22f   : > { %v1780_v29 = vshrl.u32 %v1779_v2, 30  ;;  %v1844_v25 = vshll.u32 %v6340_v19, %v1835_v52  ;;  %v1847_v12 = vshll.u32 %v6329_v27, %v1835_v52  ;;  %v1848_v61 = vshrl.u32 %v6328_v55, %v1836_v26 }
 0x230   : > { %v1695_v62 = vand.u32 2147483647, %v1694_v48  ;;  %v1840_v58 = vor.u32 %v1839_v4, %v1838_v24  ;;  %vm1606_vm7 = vcmp.lt.s32.totalorder %v5700_v34, 2  ;;  %v6416_v41 = vand.u32 2147483647, %v6390_v42 }
 0x231   : > { %v1781_v50 = vshll.u32 %v1780_v29, 30  ;;  %v1804_v17 = vsub.s32 4, %v1780_v29  ;;  %v1843_v54 = vor.u32 %v1842_v28, %v1841_v0  ;;  %v1846_v13 = vor.u32 %v1845_v16, %v1844_v25 }
 0x232   : > { %vm5758_vm5 = vcmp.le.f32.partialorder %v6416_v41, 0.7853982  ;;  %v1849_v33 = vor.u32 %v1848_v61, %v1847_v12  ;;  %v1851_v19 = vshrl.u32 %v6330_v39, %v1836_v26  ;;  %v6419_v27 = vxor.u32 2147483648, %v5717_v3 }
 0x233   : > { %v1698_v24 = vmul.f32 %v1697_v40, %v1695_v62  ;;  %v5768_v4 = vsub.s32 %v1778_v15, %v1781_v50  ;;  %vm2020_vm4 = vcmp.eq.s32.totalorder %v5732_v23, 0  ;;  %v6420_v41 = vxor.u32 2147483648, %v5725_v45 }
 0x234   : > { %v1612_v48 = vsel %vm1610_vm3, %v6419_v27, %v5725_v45  ;;  %v1837_v0 = vshrl.u32 %v6335_v63, %v1836_v26  ;;  %v1850_v39 = vshll.u32 %v6328_v55, %v1835_v52  ;;  %vm1853_vm15 = vcmp.lt.s32.totalorder %v1834_v47, 1 }
 0x235   : > { %v1609_v28 = vsel %vm1607_vm9, %v5717_v3, %v6420_v41  ;;  %vm1604_vm0 = vweird.f32 %v4437_v51  ;;  %v1699_v16 = vxor.u32 2147483648, %v1698_v24  ;;  %v1784_v40 = vsub.s32 0, %v5768_v4  ;;  %v6488_v51 = vld [vmem:[#allocation30_spill] sm:$0xff] }
 0x236   : > { %v1805_v15 = vsel %vm1720_vm2, %v1804_v17, %v1780_v29  ;;  %vm1856_vm3 = vcmp.lt.s32.totalorder %v1834_v47, 4  ;;  %v1852_v25 = vor.u32 %v1851_v19, %v1850_v39  ;;  %v1861_v61 = vsel %vm1853_vm15, %v1840_v58, %v1843_v54 }
 0x237   : > { %v1858_v12 = vsel %vm1856_vm3, %v1846_v13, 2102212464  ;;  %v1862_v62 = vsel %vm1856_vm3, %v1849_v33, 920167782  ;;  %vm2019_vm9 = vcmp.lt.s32.totalorder %v5732_v23, 2  ;;  %v1700_v55 = vsel %vm1617_vm1, %v1699_v16, %v1698_v24 }
 0x238   : > { %v3760_v63 = vmin.u32 %v1784_v40, %v5768_v4  ;;  %vm1854_vm14 = vcmp.lt.s32.totalorder %v1834_v47, 2  ;;  %vm1855_vm13 = vcmp.lt.s32.totalorder %v1834_v47, 3  ;;  %v1703_v52 = vsel %vm5646_vm12, %v6387_v46, %v1700_v55  ;;  %v6421_v40 = vld [vmem:[#allocation17_spill] sm:$0xff] }
 0x239   : > { %v1857_v26 = vsel %vm1853_vm15, %v1837_v0, %v1840_v58  ;;  %v1863_v17 = vsel %vm1855_vm13, %v1846_v13, %v1862_v62  ;;  %v1865_v29 = vsel %vm1853_vm15, %v1843_v54, %v1846_v13  ;;  %4004 = vcosq.f32 %v1703_v52 }
 0x23a   : > { %v1786_v50 = vclz %v3760_v63  ;;  %v1859_v19 = vsel %vm1855_vm13, %v1843_v54, %v1858_v12  ;;  %v1864_v27 = vsel %vm1854_vm14, %v1861_v61, %v1863_v17  ;;  %4006 = vsinq.f32 %v1703_v52 }
 0x23b   : > { %v1866_v24 = vsel %vm1856_vm3, %v1852_v25, 1326507024  ;;  %v5797_v41 = vmul.u32.u64.low %v5728_v49, %v1864_v27  ;;  %v5798_v39 = vmul.u32.u64.high %v5728_v49, %v1864_v27, %v5797_v41  ;;  %v1613_v30 = vsel %vm1606_vm7, %v1609_v28, %v1612_v48  ;;  %v6423_v25 = vld [vmem:[#allocation16_spill] sm:$0xff] }
 0x23c   : > { %v3761_v16 = vadd.s32 4294967294, %v1786_v50  ;;  %v5804_v58 = vsel %vm5758_vm5, 0, %v1805_v15  ;;  %v1867_v13 = vsel %vm1855_vm13, %v1849_v33, %v1866_v24  ;;  %v1860_v54 = vsel %vm1854_vm14, %v1857_v26, %v1859_v19 }
 0x23d   : > { %v1868_v0 = vsel %vm1854_vm14, %v1865_v29, %v1867_v13  ;;  %v6422_v12 = vxor.u32 2147483648, %v6421_v40  ;;  %vm2023_vm1 = vcmp.eq.s32.totalorder %v5732_v23, 2  ;;  %v6424_v33 = vxor.u32 2147483648, %v6423_v25 }
 0x23e   : > { %vm3762_vm12 = vcmp.lt.s32.totalorder %v3761_v16, 0  ;;  %v5815_v34 = vmul.u32.u64.low %v5728_v49, %v1868_v0  ;;  %v5816_v48 = vmul.u32.u64.high %v5728_v49, %v1868_v0, %v5815_v34  ;;  %v5823_v47 = vsel %vm1604_vm0, nan, %v1613_v30 }
 0x23f   : > { %v2022_v61 = vsel %vm2020_vm4, %v6423_v25, %v6422_v12  ;;  %v2025_v28 = vsel %vm2023_vm1, %v6424_v33, %v6421_v40  ;;  %v1774_v15 = vadd.s32 %v5683_v38, %v5697_v36  ;;  %v1789_v62 = vsel %vm3762_vm12, 0, %v3761_v16  ;;  %v6428_v16 = vld [vmem:[#allocation20_spill] sm:$0xff]  ;;  %v6431_v34 = vld [vmem:[#allocation22_spill] sm:$0xff] }
 0x240   : > { %v1879_v55 = vadd.s32 1, %v5798_v39  ;;  %vm1710_vm13 = vcmp.eq.s32.totalorder %v5720_v31, 0  ;;  %vm1713_vm14 = vcmp.eq.s32.totalorder %v5720_v31, 2  ;;  %v1790_v63 = vsub.s32 32, %v1789_v62 }
 0x241   : > { %v1794_v52 = vsub.s32 4294967266, %v1789_v62  ;;  %v5831_v26 = vand.u32 3, %v5804_v58  ;;  %v2026_v17 = vsel %vm2019_vm9, %v2022_v61, %v2025_v28  ;;  %v1876_v29 = vmul.u32 %v5728_v49, %v1860_v54  ;;  %v6426_v49 = vld [vmem:[#allocation21_spill] sm:$0xff] }
 0x242   : > { %vm2123_vm7 = vcmp.lt.s32.totalorder %v5741_v1, 2  ;;  %vm2124_vm4 = vcmp.eq.s32.totalorder %v5741_v1, 0  ;;  %v2226_v38 = vand.u32 3, %v5735_v44  ;;  %v1791_v36 = vshll.u32 %v5768_v4, %v1789_v62 }
 0x243   : > { %v1792_v50 = vshrl.u32 %v1774_v15, %v1790_v63  ;;  %v1795_v19 = vadd.s32 127, %v1794_v52  ;;  %vm1878_vm15 = vc.u32 %v5816_v48, %v5797_v41  ;;  %vm1709_vm3 = vcmp.lt.s32.totalorder %v5720_v31, 2  ;;  %v5851_v44 = vpop.eup %4004 }
 0x244   : > { %v1880_v27 = vsel %vm1878_vm15, %v1879_v55, %v5798_v39  ;;  %v5845_v24 = vsel %vm368_vm6, nan, %v2026_v17  ;;  %v6427_v30 = vxor.u32 2147483648, %v6426_v49  ;;  %vm2127_vm9 = vcmp.eq.s32.totalorder %v5741_v1, 2  ;;  %v5854_v40 = vpop.eup %4006 }
 0x245   : > { %v1793_v4 = vor.u32 %v1792_v50, %v1791_v36  ;;  %v1796_v54 = vshll.u32 %v1795_v19, 23  ;;  %vm1823_vm1 = vcmp.lt.s32.totalorder %v6405_v7, 0  ;;  %v1881_v0 = vadd.s32 %v1880_v27, %v1876_v29  ;;  %v6433_v29 = vld [vmem:[#allocation25_spill] sm:$0xff] }
 0x246   : > { %v2126_v13 = vsel %vm2124_vm4, %v6428_v16, %v6427_v30  ;;  %vm2228_vm12 = vcmp.eq.s32.totalorder %v2226_v38, 0  ;;  %v1714_v39 = vxor.u32 2147483648, %v5851_v44  ;;  %v6429_v12 = vxor.u32 2147483648, %v6428_v16 }
 0x247   : > { %v6430_v61 = vxor.u32 2147483648, %v4704_v5  ;;  %v2330_v28 = vand.u32 3, %v5744_v9  ;;  %vm1707_vm6 = vweird.f32 %v6387_v46  ;;  %v1711_v15 = vxor.u32 2147483648, %v5854_v40 }
 0x248   : > { %v2129_v25 = vsel %vm2127_vm9, %v6429_v12, %v6426_v49  ;;  %v1797_v62 = vor.u32 4788187, %v1796_v54  ;;  %v1882_v55 = vadd.s32 536870912, %v1881_v0  ;;  %vm2231_vm4 = vcmp.eq.s32.totalorder %v2226_v38, 2 }
 0x249   : > { %v2230_v33 = vsel %vm2228_vm12, %v6431_v34, %v6430_v61  ;;  %v5867_v63 = vadd.s32 %v5797_v41, %v5816_v48  ;;  %vm2227_vm15 = vcmp.lt.s32.totalorder %v2226_v38, 2  ;;  %v6432_v52 = vxor.u32 2147483648, %v6431_v34 }
 0x24a   : > { %v2433_v36 = vadd.s32 3, %v6433_v29  ;;  %v1798_v50 = vand.u32 2147483647, %v1797_v62  ;;  %v1800_v19 = vcvt.s32.f32 %v1793_v4  ;;  %v6434_v9 = vand.u32 2147483647, %v6405_v7  ;;  %v6440_v29 = vld [vmem:[#allocation27_spill] sm:$0xff] }
 0x24b   : > { %v2233_v17 = vsel %vm2231_vm4, %v6432_v52, %v4704_v5  ;;  %v1883_v23 = vshrl.u32 %v1882_v55, 30  ;;  %v2130_v41 = vsel %vm2123_vm7, %v2126_v13, %v2129_v25  ;;  %v1712_v5 = vsel %vm1710_vm13, %v5851_v44, %v1711_v15  ;;  %v6439_v25 = vld [vmem:[#allocation28_spill] sm:$0xff] }
 0x24c   : > { %vm5875_vm9 = vcmp.le.f32.partialorder %v6434_v9, 0.7853982  ;;  %v1715_v48 = vsel %vm1713_vm14, %v1714_v39, %v5854_v40  ;;  %v2234_v38 = vsel %vm2227_vm15, %v2230_v33, %v2233_v17  ;;  %vm2332_vm12 = vcmp.eq.s32.totalorder %v2330_v28, 0 }
 0x24d   : > { %v1801_v49 = vmul.f32 %v1800_v19, %v1798_v50  ;;  %v1884_v30 = vshll.u32 %v1883_v23, 30  ;;  %v1907_v16 = vsub.s32 4, %v1883_v23  ;;  %vm2335_vm4 = vcmp.eq.s32.totalorder %v2330_v28, 2 }
 0x24e   : > { %v6437_v1 = vxor.u32 2147483648, %v4824_v32  ;;  %v6438_v4 = vxor.u32 2147483648, %v4782_v22  ;;  %v2434_v12 = vand.u32 3, %v2433_v36  ;;  %v2537_v61 = vadd.s32 3, %v6439_v25  ;;  %v6442_v36 = vld [vmem:[#allocation26_spill] sm:$0xff] }
 0x24f   : > { %v1716_v34 = vsel %vm1709_vm3, %v1712_v5, %v1715_v48  ;;  %v1802_v33 = vxor.u32 2147483648, %v1801_v49  ;;  %v5900_v62 = vsub.s32 %v1881_v0, %v1884_v30  ;;  %v2641_v55 = vadd.s32 3, %v4989_v8 }
 0x250   : > { %v2334_v13 = vsel %vm2332_vm12, %v4782_v22, %v6437_v1  ;;  %v2337_v54 = vsel %vm2335_vm4, %v6438_v4, %v4824_v32  ;;  %v1908_v52 = vsel %vm1823_vm1, %v1907_v16, %v1883_v23  ;;  %v5907_v17 = vsel %vm471_vm8, nan, %v2130_v41 }
 0x251   : > { %v5911_v22 = vsel %vm574_vm10, nan, %v2234_v38  ;;  %vm2331_vm13 = vcmp.lt.s32.totalorder %v2330_v28, 2  ;;  %v1803_v32 = vsel %vm1720_vm2, %v1802_v33, %v1801_v49  ;;  %v1887_v31 = vsub.s32 0, %v5900_v62 }
 0x252   : > { %v2338_v0 = vsel %vm2331_vm13, %v2334_v13, %v2337_v54  ;;  %vm2436_vm14 = vcmp.eq.s32.totalorder %v2434_v12, 0  ;;  %v5918_v8 = vsel %vm1707_vm6, nan, %v1716_v34  ;;  %v1806_v35 = vsel %vm5758_vm5, %v6390_v42, %v1803_v32 }
 0x253   : > { %v6441_v37 = vxor.u32 2147483648, %v6440_v29  ;;  %v2538_v28 = vand.u32 3, %v2537_v61  ;;  %4008 = vcosq.f32 %v1806_v35  ;;  %v3764_v19 = vmin.u32 %v1887_v31, %v5900_v62 }
 0x254   : > { %vm2439_vm8 = vcmp.eq.s32.totalorder %v2434_v12, 2  ;;  %v2642_v9 = vand.u32 3, %v2641_v55  ;;  %4010 = vsinq.f32 %v1806_v35  ;;  %v5929_v23 = vsel %vm5875_vm9, 0, %v1908_v52 }
 0x255   : > { %v2438_v50 = vsel %vm2436_vm14, %v6442_v36, %v6441_v37  ;;  %v5933_v41 = vsel %vm677_vm11, nan, %v2338_v0  ;;  %v6443_v2 = vxor.u32 2147483648, %v6442_v36  ;;  %v1889_v48 = vclz %v3764_v19  ;;  %v6452_v36 = vld [vmem:[#allocation34_spill] sm:$0xff] }
 0x256   : > { %vm2435_vm10 = vcmp.lt.s32.totalorder %v2434_v12, 2  ;;  %vm2540_vm2 = vcmp.eq.s32.totalorder %v2538_v28, 0  ;;  %vm2543_vm5 = vcmp.eq.s32.totalorder %v2538_v28, 2  ;;  %vm2539_vm7 = vcmp.lt.s32.totalorder %v2538_v28, 2  ;;  %v6454_v28 = vld [vmem:[#allocation33_spill] sm:$0xff] }
 0x257   : > { %v2441_v5 = vsel %vm2439_vm8, %v6443_v2, %v6440_v29  ;;  %v6444_v49 = vxor.u32 2147483648, %v4945_v20  ;;  %v6445_v16 = vxor.u32 2147483648, %v4907_v53  ;;  %v3765_v1 = vadd.s32 4294967294, %v1889_v48  ;;  %v6456_v48 = vld [vmem:[#allocation8_spill] sm:$0xff] }
 0x258   : > { %v2442_v38 = vsel %vm2435_vm10, %v2438_v50, %v2441_v5  ;;  %vm2644_vm11 = vcmp.eq.s32.totalorder %v2642_v9, 0  ;;  %vm2647_vm3 = vcmp.eq.s32.totalorder %v2642_v9, 2  ;;  %vm1816_vm15 = vcmp.eq.s32.totalorder %v5831_v26, 2 }
 0x259   : > { %v2542_v30 = vsel %vm2540_vm2, %v4907_v53, %v6444_v49  ;;  %v2545_v57 = vsel %vm2543_vm5, %v6445_v16, %v4945_v20  ;;  %v5946_v4 = vand.u32 3, %v5929_v23  ;;  %v6446_v54 = vxor.u32 2147483648, %v5127_v14  ;;  %v6448_v20 = vld [vmem:[#allocation6_spill] sm:$0xff] }
 0x25a   : > { %v2546_v13 = vsel %vm2539_vm7, %v2542_v30, %v2545_v57  ;;  %v6447_v25 = vxor.u32 2147483648, %v5065_v59  ;;  %v2745_v53 = vadd.s32 3, %v5087_v56  ;;  %vm1813_vm12 = vcmp.eq.s32.totalorder %v5831_v26, 0 }
 0x25b   : > { %v2646_v12 = vsel %vm2644_vm11, %v5065_v59, %v6446_v54  ;;  %vm3766_vm4 = vcmp.lt.s32.totalorder %v3765_v1, 0  ;;  %vm6449_vm13 = vweird.f32 %v6448_v20  ;;  %vm2643_vm14 = vcmp.lt.s32.totalorder %v2642_v9, 2  ;;  %v6451_v59 = vld [vmem:[#allocation36_spill] sm:$0xff]  ;;  %v6460_v54 = vld [vmem:[#allocation37_spill] sm:$0xff] }
 0x25c   : > { %v2649_v61 = vsel %vm2647_vm3, %v6447_v25, %v5127_v14  ;;  %v5958_v34 = vsel %vm6449_vm13, nan, %v2442_v38  ;;  %v2849_v33 = vadd.s32 3, %v5248_v18  ;;  %v1892_v55 = vsel %vm3766_vm4, 0, %v3765_v1  ;;  %v6458_v1 = vld [vmem:[#allocation38_spill] sm:$0xff]  ;;  %v6461_v25 = vld [vmem:[#allocation12_spill] sm:$0xff] }
 0x25d   : > { %vm6450_vm8 = vweird.f32 %v4405_v6  ;;  %v2746_v32 = vand.u32 3, %v2745_v53  ;;  %v2953_v14 = vadd.s32 3, %v6451_v59  ;;  %v1893_v31 = vsub.s32 32, %v1892_v55  ;;  %v5967_v37 = vpop.eup %4008 }
 0x25e   : > { %v5963_v52 = vsel %vm6450_vm8, nan, %v2546_v13  ;;  %v1897_v56 = vsub.s32 4294967266, %v1892_v55  ;;  %v2650_v0 = vsel %vm2643_vm14, %v2646_v12, %v2649_v61  ;;  %v2850_v35 = vand.u32 3, %v2849_v33  ;;  %v5977_v5 = vpop.eup %4010  ;;  %v6462_v33 = vld [vmem:[#allocation9_spill] sm:$0xff] }
 0x25f   : > { %v1894_v29 = vshll.u32 %v5900_v62, %v1892_v55  ;;  %vm2747_vm10 = vcmp.lt.s32.totalorder %v2746_v32, 2  ;;  %vm2748_vm2 = vcmp.eq.s32.totalorder %v2746_v32, 0  ;;  %vm2751_vm5 = vcmp.eq.s32.totalorder %v2746_v32, 2 }
 0x260   : > { %vm1812_vm7 = vcmp.lt.s32.totalorder %v5831_v26, 2  ;;  %v1895_v6 = vshrl.u32 %v5867_v63, %v1893_v31  ;;  %v1898_v18 = vadd.s32 127, %v1897_v56  ;;  %v6453_v50 = vxor.u32 2147483648, %v6452_v36 }
 0x261   : > { %v6455_v9 = vxor.u32 2147483648, %v6454_v28  ;;  %v1817_v62 = vxor.u32 2147483648, %v5967_v37  ;;  %vm6457_vm11 = vweird.f32 %v6456_v48  ;;  %v2954_v30 = vand.u32 3, %v2953_v14 }
 0x262   : > { %v2750_v19 = vsel %vm2748_vm2, %v6454_v28, %v6453_v50  ;;  %v5982_v38 = vsel %vm6457_vm11, nan, %v2650_v0  ;;  %v1814_v63 = vxor.u32 2147483648, %v5977_v5  ;;  %v1896_v16 = vor.u32 %v1895_v6, %v1894_v29  ;;  %v6467_v6 = vld [vmem:[#allocation41_spill] sm:$0xff] }
 0x263   : > { %v2753_v2 = vsel %vm2751_vm5, %v6455_v9, %v6452_v36  ;;  %v1899_v57 = vshll.u32 %v1898_v18, 23  ;;  %vm2852_vm3 = vcmp.eq.s32.totalorder %v2850_v35, 0  ;;  %vm2851_vm4 = vcmp.lt.s32.totalorder %v2850_v35, 2 }
 0x264   : > { %v2754_v49 = vsel %vm2747_vm10, %v2750_v19, %v2753_v2  ;;  %v6459_v13 = vxor.u32 2147483648, %v6458_v1  ;;  %vm2855_vm13 = vcmp.eq.s32.totalorder %v2850_v35, 2  ;;  %v3057_v61 = vadd.s32 3, %v6461_v25  ;;  %v6465_v35 = vld [vmem:[#allocation42_spill] sm:$0xff]  ;;  %v6469_v2 = vld [vmem:[#allocation7_spill] sm:$0xff] }
 0x265   : > { %v1818_v53 = vsel %vm1816_vm15, %v1817_v62, %v5977_v5  ;;  %v1900_v20 = vor.u32 4788187, %v1899_v57  ;;  %vm6463_vm14 = vweird.f32 %v6462_v33  ;;  %v6464_v32 = vxor.u32 2147483648, %v6460_v54 }
 0x266   : > { %v2854_v12 = vsel %vm2852_vm3, %v6460_v54, %v6459_v13  ;;  %v5996_v55 = vsel %vm6463_vm14, nan, %v2754_v49  ;;  %v1815_v14 = vsel %vm1813_vm12, %v5967_v37, %v1814_v63  ;;  %v1903_v31 = vcvt.s32.f32 %v1896_v16  ;;  %v6470_v13 = vld [vmem:[#allocation43_spill] sm:$0xff] }
 0x267   : > { %v2857_v59 = vsel %vm2855_vm13, %v6464_v32, %v6458_v1  ;;  %vm2955_vm8 = vcmp.lt.s32.totalorder %v2954_v30, 2  ;;  %vm2956_vm10 = vcmp.eq.s32.totalorder %v2954_v30, 0  ;;  %v1901_v56 = vand.u32 2147483647, %v1900_v20 }
 0x268   : > { %v2858_v0 = vsel %vm2851_vm4, %v2854_v12, %v2857_v59  ;;  %v6466_v29 = vxor.u32 2147483648, %v6465_v35  ;;  %vm2959_vm15 = vcmp.eq.s32.totalorder %v2954_v30, 2  ;;  %v6468_v36 = vxor.u32 2147483648, %v6467_v6 }
 0x269   : > { %v3058_v28 = vand.u32 3, %v3057_v61  ;;  %v3161_v19 = vadd.s32 3, %v5490_v21  ;;  %v3265_v9 = vadd.s32 3, %v5616_v60  ;;  %vm275_vm12 = vcmp.lt.s32.totalorder %v6469_v2, 64  ;;  %v6472_v21 = vld [vmem:[#allocation13_spill] sm:$0xff] }
 0x26a   : > { %v2958_v18 = vsel %vm2956_vm10, %v6467_v6, %v6466_v29  ;;  %v2961_v50 = vsel %vm2959_vm15, %v6468_v36, %v6465_v35  ;;  %v1904_v48 = vmul.f32 %v1903_v31, %v1901_v56  ;;  %v3369_v16 = vadd.s32 3, %v5704_v10  ;;  %v6478_v31 = vld [vmem:[#allocation45_spill] sm:$0xff] }
 0x26b   : > { %v2962_v49 = vsel %vm2955_vm8, %v2958_v18, %v2961_v50  ;;  %v3473_v57 = vadd.s32 3, %v5804_v58  ;;  %v1819_v30 = vsel %vm1812_vm7, %v1815_v14, %v1818_v53  ;;  %vm3059_vm2 = vcmp.lt.s32.totalorder %v3058_v28, 2  ;;  %v6482_v18 = vld [vmem:[#allocation10_spill] sm:$0xff] }
 0x26c   : > { %vm3060_vm5 = vcmp.eq.s32.totalorder %v3058_v28, 0  ;;  %vm3063_vm11 = vcmp.eq.s32.totalorder %v3058_v28, 2  ;;  %v1905_v1 = vxor.u32 2147483648, %v1904_v48  ;;  %v6471_v54 = vxor.u32 2147483648, %v6470_v13 }
 0x26d   : > { %v6473_v60 = vxor.u32 2147483648, %v6472_v21  ;;  %v3162_v61 = vand.u32 3, %v3161_v19  ;;  %vm6474_vm3 = vweird.f32 %v4417_v11  ;;  %vm6475_vm7 = vweird.f32 %v4420_v43  ;;  %v6476_v11 = vld [vmem:[#allocation46_spill] sm:$0xff] }
 0x26e   : > { %v3062_v12 = vsel %vm3060_vm5, %v6472_v21, %v6471_v54  ;;  %v2859_v10 = vsel %vm6474_vm3, nan, %v2858_v0  ;;  %v2963_v58 = vsel %vm6475_vm7, nan, %v2962_v49  ;;  %v3266_v53 = vand.u32 3, %v3265_v9 }
 0x26f   : > { %v3065_v25 = vsel %vm3063_vm11, %v6473_v60, %v6470_v13  ;;  %v1906_v20 = vsel %vm1823_vm1, %v1905_v1, %v1904_v48  ;;  %vm3164_vm4 = vcmp.eq.s32.totalorder %v3162_v61, 0  ;;  %v3370_v33 = vand.u32 3, %v3369_v16  ;;  %v6495_v60 = vld [vmem:[#allocation47_spill] sm:$0xff] }
 0x270   : > { %v3066_v26 = vsel %vm3059_vm2, %v3062_v12, %v3065_v25  ;;  %v3474_v32 = vand.u32 3, %v3473_v57  ;;  %vm1810_vm13 = vweird.f32 %v6390_v42  ;;  %v1909_v59 = vsel %vm5875_vm9, %v6405_v7, %v1906_v20  ;;  %v6487_v57 = vld [vmem:[#allocation29_spill] sm:$0xff]  ;;  %v6493_v42 = vld [vmem:[#allocation40_spill] sm:$0xff] }
 0x271   : > { %vm3163_vm14 = vcmp.lt.s32.totalorder %v3162_v61, 2  ;;  %v6477_v14 = vxor.u32 2147483648, %v6476_v11  ;;  %vm3167_vm8 = vcmp.eq.s32.totalorder %v3162_v61, 2  ;;  %4012 = vcosq.f32 %v1909_v59  ;;  %v6494_v12 = vld [vmem:[#allocation44_spill] sm:$0xff] }
 0x272   : > { %v6479_v56 = vxor.u32 2147483648, %v6478_v31  ;;  %vm3268_vm1 = vcmp.eq.s32.totalorder %v3266_v53, 0  ;;  %vm3271_vm10 = vcmp.eq.s32.totalorder %v3266_v53, 2  ;;  %4014 = vsinq.f32 %v1909_v59 }
 0x273   : > { %v3166_v43 = vsel %vm3164_vm4, %v6478_v31, %v6477_v14  ;;  %vm3267_vm15 = vcmp.lt.s32.totalorder %v3266_v53, 2  ;;  %v6480_v27 = vxor.u32 2147483648, %v5725_v45  ;;  %v6481_v29 = vxor.u32 2147483648, %v5717_v3  ;;  %v6497_v53 = vld [vmem:[#allocation15_spill] sm:$0xff] }
 0x274   : > { %v3169_v0 = vsel %vm3167_vm8, %v6479_v56, %v6476_v11  ;;  %vm6483_vm9 = vweird.f32 %v6482_v18  ;;  %vm3372_vm2 = vcmp.eq.s32.totalorder %v3370_v33, 0  ;;  %vm3371_vm5 = vcmp.lt.s32.totalorder %v3370_v33, 2 }
 0x275   : > { %v3270_v35 = vsel %vm3268_vm1, %v5717_v3, %v6480_v27  ;;  %v3273_v6 = vsel %vm3271_vm10, %v6481_v29, %v5725_v45  ;;  %v3067_v36 = vsel %vm6483_vm9, nan, %v3066_v26  ;;  %v3170_v50 = vsel %vm3163_vm14, %v3166_v43, %v3169_v0 }
 0x276   : > { %v3274_v28 = vsel %vm3267_vm15, %v3270_v35, %v3273_v6  ;;  %v3374_v19 = vsel %vm3372_vm2, %v5851_v44, %v1711_v15  ;;  %vm3375_vm11 = vcmp.eq.s32.totalorder %v3370_v33, 2  ;;  %vm3475_vm3 = vcmp.lt.s32.totalorder %v3474_v32, 2  ;;  %v6484_v15 = vld [vmem:[#allocation23_spill] sm:$0xff] }
 0x277   : > { %v3377_v9 = vsel %vm3375_vm11, %v1714_v39, %v5854_v40  ;;  %vm3476_vm7 = vcmp.eq.s32.totalorder %v3474_v32, 0  ;;  %vm3479_vm4 = vcmp.eq.s32.totalorder %v3474_v32, 2  ;;  %v3577_v3 = vadd.s32 3, %v5929_v23  ;;  %v6485_v44 = vld [vmem:[#allocation11_spill] sm:$0xff] }
 0x278   : > { %v3378_v45 = vsel %vm3371_vm5, %v3374_v19, %v3377_v9  ;;  %v3478_v48 = vsel %vm3476_vm7, %v5967_v37, %v1814_v63  ;;  %v3481_v49 = vsel %vm3479_vm4, %v1817_v62, %v5977_v5  ;;  %v3588_v16 = vsel %vm275_vm12, %v6484_v15, %v5845_v24  ;;  %v6489_v5 = vld [vmem:[#allocation31_spill] sm:$0xff]  ;;  %v6490_v62 = vld [vmem:[#allocation32_spill] sm:$0xff] }
 0x279   : > { %vm6486_vm14 = vweird.f32 %v6485_v44  ;;  %v3275_v39 = vsel %vm1604_vm0, nan, %v3274_v28  ;;  %v3482_v23 = vsel %vm3475_vm3, %v3478_v48, %v3481_v49  ;;  %v3589_v63 = vsel %vm275_vm12, %v6487_v57, %v5907_v17  ;;  %3604 = vst [vmem:[%s6077_s3] sm:$0xff] %v3588_v16 }
 0x27a   : > { %v3171_v40 = vsel %vm6486_vm14, nan, %v3170_v50  ;;  %v3379_v24 = vsel %vm1707_vm6, nan, %v3378_v45  ;;  %v3590_v37 = vsel %vm275_vm12, %v6488_v51, %v5911_v22  ;;  %v3591_v17 = vsel %vm275_vm12, %v6489_v5, %v5933_v41  ;;  %3605 = vst [vmem:[%s6077_s3 + $0x8] sm:$0xff] %v3589_v63  ;;  %v6491_v22 = vld [vmem:[#allocation35_spill] sm:$0xff] }
 0x27b   : > { %v3592_v1 = vsel %vm275_vm12, %v6490_v62, %v5958_v34  ;;  %v1820_v46 = vsel %vm1810_vm13, nan, %v1819_v30  ;;  %v3483_v13 = vsel %vm1810_vm13, nan, %v3482_v23  ;;  %v3578_v54 = vand.u32 3, %v3577_v3  ;;  %3606 = vst [vmem:[%s6077_s3 + $0x10] sm:$0xff] %v3590_v37  ;;  %3607 = vst [vmem:[%s6077_s3 + $0x18] sm:$0xff] %v3591_v17  ;;  %v6492_v34 = vld [vmem:[#allocation39_spill] sm:$0xff]  ;;  %v4013_v61 = vpop.eup %4012 }
 0x27c   : > { %v3593_v41 = vsel %vm275_vm12, %v6491_v22, %v5963_v52  ;;  %3608 = vst [vmem:[%s6077_s3 + $0x20] sm:$0xff] %v3592_v1  ;;  %v3594_v30 = vsel %vm275_vm12, %v6492_v34, %v5982_v38  ;;  %v3595_v21 = vsel %vm275_vm12, %v6493_v42, %v5996_v55  ;;  %v3596_v52 = vsel %vm275_vm12, %v6494_v12, %v2859_v10  ;;  %v6496_v38 = vld [vmem:[#allocation14_spill] sm:$0xff]  ;;  %v4015_v20 = vpop.eup %4014 }
 0x27d   : > { %v3597_v25 = vsel %vm275_vm12, %v6495_v60, %v2963_v58  ;;  %3609 = vst [vmem:[%s6077_s3 + $0x28] sm:$0xff] %v3593_v41  ;;  %v3598_v26 = vsel %vm275_vm12, %v6496_v38, %v3067_v36  ;;  %v3599_v55 = vsel %vm275_vm12, %v6497_v53, %v3171_v40  ;;  %v3600_v10 = vsel %vm275_vm12, %v5823_v47, %v3275_v39 }
 0x27e   : > { %v3601_v58 = vsel %vm275_vm12, %v5918_v8, %v3379_v24  ;;  %3610 = vst [vmem:[%s6077_s3 + $0x30] sm:$0xff] %v3594_v30  ;;  %3611 = vst [vmem:[%s6077_s3 + $0x38] sm:$0xff] %v3595_v21  ;;  %v1920_v33 = vxor.u32 2147483648, %v4013_v61  ;;  %v3602_v32 = vsel %vm275_vm12, %v1820_v46, %v3483_v13  ;;  %v1917_v47 = vxor.u32 2147483648, %v4015_v20 }
 0x27f   : > { %3612 = vst [vmem:[%s6077_s3 + $0x40] sm:$0xff] %v3596_v52  ;;  %3613 = vst [vmem:[%s6077_s3 + $0x48] sm:$0xff] %v3597_v25  ;;  %vm1919_vm0 = vcmp.eq.s32.totalorder %v5946_v4, 2  ;;  %vm3583_vm6 = vcmp.eq.s32.totalorder %v3578_v54, 2  ;;  %vm1916_vm13 = vcmp.eq.s32.totalorder %v5946_v4, 0  ;;  %vm3580_vm8 = vcmp.eq.s32.totalorder %v3578_v54, 0 }
 0x280   : > { %3614 = vst [vmem:[%s6077_s3 + $0x50] sm:$0xff] %v3598_v26  ;;  %3615 = vst [vmem:[%s6077_s3 + $0x58] sm:$0xff] %v3599_v55  ;;  %v1921_v8 = vsel %vm1919_vm0, %v1920_v33, %v4015_v20  ;;  %v3585_v59 = vsel %vm3583_vm6, %v1920_v33, %v4015_v20  ;;  %vm1915_vm1 = vcmp.lt.s32.totalorder %v5946_v4, 2  ;;  %v1918_v11 = vsel %vm1916_vm13, %v4013_v61, %v1917_v47 }
 0x281   : > { %3616 = vst [vmem:[%s6077_s3 + $0x60] sm:$0xff] %v3600_v10  ;;  %3617 = vst [vmem:[%s6077_s3 + $0x68] sm:$0xff] %v3601_v58  ;;  %vm3579_vm10 = vcmp.lt.s32.totalorder %v3578_v54, 2  ;;  %v3582_v14 = vsel %vm3580_vm8, %v4013_v61, %v1917_v47  ;;  %vm1913_vm15 = vweird.f32 %v6405_v7  ;;  %v1922_v31 = vsel %vm1915_vm1, %v1918_v11, %v1921_v8 }
 0x282   : > { %3618 = vst [vmem:[%s6077_s3 + $0x70] sm:$0xff] %v3602_v32  ;;  %v3586_v43 = vsel %vm3579_vm10, %v3582_v14, %v3585_v59  ;;  %v1923_v56 = vsel %vm1913_vm15, nan, %v1922_v31 }
 0x283   : > { %v3587_v4 = vsel %vm1913_vm15, nan, %v3586_v43 }
 0x284   : > { %v3603_v0 = vsel %vm275_vm12, %v1923_v56, %v3587_v4 }
 0x285   : > { %3619 = vst [vmem:[%s6077_s3 + $0x78] sm:$0xff] %v3603_v0 }
 0x286   : > { %4029 = shalt.err (!%p4026_p3)
}
 0x287   : > { %s4030_s22 = scalar_lea.hbm %s6153_s8, 2048  ;;  %s4034_s25 = scalar_lea.hbm %s6205_s2, 4096 }
 0x288   : > { %p4031_p4 = scmp.ne.s32.totalorder %s6153_s8, %s4030_s22  ;;  %p4035_p9 = scmp.lt.u32.totalorder %s6153_s8, %s6205_s2 }
 0x289   : > { %p4036_p10 = scmp.lt.u32.totalorder %s4034_s25, %s4030_s22  ;;  %p4038_p12 = scmp.lt.u32.totalorder %s4030_s22, %s6153_s8 }
 0x28a   : > { %p4032_p7 = pnand %p4031_p4, %p4144_p5 }
 0x28b   : > { %p4037_p11 = por %p4036_p10, %p4035_p9 }
 0x28c   : > { %p4033_p8 = pneg %p4032_p7 }
 0x28d   : > { %p4039_p13 = por %p4038_p12, %p4037_p11 }
 0x28f   : > { %p4040_p0 = pnand %p4039_p13, %p4033_p8 }
 0x291   : > { %4043 = shalt.err (!%p4040_p0)
}
 0x292   : > { %s4089_s28 = smov 128   ;;  %s4090_s29 = smov 8  }
 0x293   : > { %3901 = dma.vmem_to_hbm [thread:$0]  (%p4144_p5), %s6155_s5, 2048, %s6153_s8, %s6162_s13, %s4089_s28, %s4089_s28, %s4090_s29  }
 0x294 PF: > { %p3907_p1 = scmp.ge.s32.totalorder %s4078_s12, 2  ;;  %s3649_s30 = sand.u32 1, %s4066_s9  }
 0x295   : > { %s3650_s3 = scalar_lea.sflag [#allocation3], %s3649_s30 }
 0x296   : > { %p3904_p2 = pnand %p3907_p1, %p4148_p6 }
 0x298   : > { %4061 = dma.done.wait (!%p3904_p2), %s3650_s3, 2048  }
 0x299   : > { %4063 = vsyncadd (!%p3904_p2), %s3650_s3, 4294965248  ;;  %p12_p3 = scmp.ge.s32.totalorder %s4131_s15, 4   ;;  %s6498_s9 = smov %s4070_s10 }
 0x29a   : > { %s6499_s10 = smov %s4074_s11  ;;  %s6500_s11 = smov %s4142_s18 }
 0x29b   : > { %s6501_s12 = smov %s4131_s15  ;;  %14 = sbr.rel (!%p12_p3) target bundleno = 3 (0x3), region = 63 }
 0x2a2   :  { %3655 = vsyncpa [#allocation3], 1 }
 0x2a3   :  { %3657 = vsyncpa [#allocation3 + $0x1], 1 }

</bundles_post_ra>
